<compile_context>
chip_gen: v5e
topology: v5e:2x2
jax: 0.10.0
libtpu: 0.0.40
codegen_flags: <defaults>
</compile_context>

<pallas_src>
import functools

import jax
import jax.numpy as jnp
from jax.experimental import pallas as pl
from jax.experimental.pallas import tpu as pltpu

NC = 3
NDF = 8
IMAGE_SIZE = 16
BATCH = 2
BN_EPS = 1e-5


# ---------------------------------------------------------------------------
# Fused whole-network kernel: one matmul per conv (+ BN + activation), all in
# VMEM, single grid step.
# ---------------------------------------------------------------------------
def _fused_netd_kernel(*refs, meta):
    """refs = [x, {A, [m_red, m_bc, gamma, beta] if BN} per layer ..., out]."""
    x_ref, o_ref = refs[0], refs[-1]
    params = refs[1:-1]

    h = x_ref[...]                                        # (B, H*W*Cin), f32
    p = 0
    for lyr in meta:
        a = params[p][...]                                # (H*W*Cin, OH*OW*Cout)
        p += 1
        z = jnp.dot(h, a, preferred_element_type=jnp.float32)

        if lyr["use_bn"]:
            # Training-mode BatchNorm over (B, OH, OW) per channel.  The flat
            # column order is (oh, ow, c) with c fastest, so per-channel
            # reduction / broadcast is done with constant 0/1 matrices
            # m_red (OH*OW*C, C) and m_bc = m_red.T -- MXU work, no reshapes.
            m_red = params[p][...]
            m_bc = params[p + 1][...]
            gamma = params[p + 2][...]                    # (1, C)
            beta = params[p + 3][...]                     # (1, C)
            p += 4
            inv_n = 1.0 / lyr["bn_count"]
            col_sum = jnp.sum(z, axis=0, keepdims=True)   # (1, OH*OW*C)
            mean_c = jnp.dot(col_sum, m_red,
                             preferred_element_type=jnp.float32) * inv_n
            cent = z - jnp.dot(mean_c, m_bc,
                               preferred_element_type=jnp.float32)
            var_c = jnp.dot(jnp.sum(cent * cent, axis=0, keepdims=True), m_red,
                            preferred_element_type=jnp.float32) * inv_n
            scale_c = gamma * jax.lax.rsqrt(var_c + BN_EPS)   # gamma folded in
            z = cent * jnp.dot(scale_c, m_bc,
                               preferred_element_type=jnp.float32) \
                + jnp.dot(beta, m_bc, preferred_element_type=jnp.float32)

        if lyr["activation"] == "lrelu":
            h = jnp.maximum(z, 0.2 * z)                   # LeakyReLU(0.2)
        else:                                             # sigmoid head
            h = pl.reciprocal(1.0 + jnp.exp(-z), approx=True)

    o_ref[...] = h.astype(o_ref.dtype)


# ---------------------------------------------------------------------------
# Weight-only glue: fold a conv (stride / zero-pad) into a dense matrix so
# that NHWC-flat `x @ A` == conv(x).  Runs outside the kernel.
# ---------------------------------------------------------------------------
def _conv_as_matrix(w_oihw, in_size, stride, pad):
    cout, cin, kh, kw = w_oihw.shape
    h = w = in_size
    oh = (h + 2 * pad - kh) // stride + 1
    ow = (w + 2 * pad - kw) // stride + 1
    dt = w_oihw.dtype
    sel_h = (jnp.arange(h)[None, None, :] ==
             (jnp.arange(oh)[None, :, None] * stride
              + jnp.arange(kh)[:, None, None] - pad)).astype(dt)   # (KH, OH, H)
    sel_w = (jnp.arange(w)[None, None, :] ==
             (jnp.arange(ow)[None, :, None] * stride
              + jnp.arange(kw)[:, None, None] - pad)).astype(dt)   # (KW, OW, W)
    # A[ih, iw, ci, oh, ow, co] = sum_{kh,kw} sel_h * sel_w * W[co, ci, kh, kw]
    a = jnp.einsum('koh,lpw,cdkl->hwdopc', sel_h, sel_w, w_oihw)
    return a.reshape(h * w * cin, oh * ow * cout), oh


# ---------------------------------------------------------------------------
# _netD parameters (deterministic init, mirrors buildNet) and forward
# ---------------------------------------------------------------------------
def init_netd_params(key, nc=NC, ndf=NDF, nsize=IMAGE_SIZE):
    layers = []
    depth_in, depth_out, size_map = nc, ndf, nsize
    while size_map > 4:
        key, wk, gk = jax.random.split(key, 3)
        w = 0.02 * jax.random.normal(wk, (depth_out, depth_in, 4, 4), jnp.float32)
        use_bn = size_map < nsize
        gamma = (1.0 + 0.02 * jax.random.normal(gk, (depth_out,), jnp.float32)
                 if use_bn else jnp.ones((depth_out,), jnp.float32))
        beta = jnp.zeros((depth_out,), jnp.float32)
        layers.append(dict(w=w, gamma=gamma, beta=beta, stride=2, pad=1,
                           use_bn=use_bn, activation="lrelu"))
        depth_in, depth_out, size_map = depth_out, 2 * depth_out, size_map // 2
    key, wk = jax.random.split(key)
    w = 0.02 * jax.random.normal(wk, (1, depth_in, 4, 4), jnp.float32)
    layers.append(dict(w=w, gamma=jnp.ones((1,), jnp.float32),
                       beta=jnp.zeros((1,), jnp.float32), stride=1, pad=0,
                       use_bn=False, activation="sigmoid"))
    return layers


def netd_forward(x_nchw, layers):
    # TODO(synk): ngpu>1 nn.parallel.data_parallel branch is a multi-device
    # dispatch detail, not math; the single-device path is implemented.
    b = x_nchw.shape[0]
    size = x_nchw.shape[2]

    # Single layout change at the module boundary: NCHW -> flat NHWC rows.
    x_flat = x_nchw.transpose(0, 2, 3, 1).reshape(b, -1)

    operands = [x_flat]
    meta = []
    out_features = None
    for lyr in layers:
        a_mat, out_size = _conv_as_matrix(lyr["w"], size, lyr["stride"],
                                          lyr["pad"])
        operands.append(a_mat)
        cout = lyr["w"].shape[0]
        entry = dict(use_bn=lyr["use_bn"], activation=lyr["activation"],
                     bn_count=float(b * out_size * out_size))
        if lyr["use_bn"]:
            hw = out_size * out_size
            m_bc = jnp.tile(jnp.eye(cout, dtype=jnp.float32), (1, hw))  # (C, HW*C)
            operands += [m_bc.T, m_bc,
                         lyr["gamma"].reshape(1, cout).astype(jnp.float32),
                         lyr["beta"].reshape(1, cout).astype(jnp.float32)]
        meta.append(entry)
        size = out_size
        out_features = a_mat.shape[1]

    kernel = functools.partial(_fused_netd_kernel, meta=tuple(meta))
    out = pl.pallas_call(
        kernel,
        out_shape=jax.ShapeDtypeStruct((b, out_features), jnp.float32),
        grid=(1,),
        in_specs=[pl.BlockSpec(op.shape, lambda i: (0, 0)) for op in operands],
        out_specs=pl.BlockSpec((b, out_features), lambda i: (0, 0)),
        compiler_params=pltpu.CompilerParams(
            dimension_semantics=("arbitrary",)),
    )(*operands)
    return out.reshape(-1, 1)                             # output.view(-1, 1)


if __name__ == "__main__":
    key = jax.random.PRNGKey(0)
    key, xk = jax.random.split(key)
    x = jax.random.normal(xk, (BATCH, NC, IMAGE_SIZE, IMAGE_SIZE), jnp.float32)

    params = init_netd_params(jax.random.PRNGKey(0))
    fwd = jax.jit(lambda inp: netd_forward(inp, params))
    out = jax.block_until_ready(fwd(x))

    assert out.shape == (BATCH, 1), out.shape
    assert bool(jnp.all((out > 0.0) & (out < 1.0))), "sigmoid range check failed"
    print("KERNEL_OK")
</pallas_src>

<mosaic_0001>
module attributes {stable_mosaic.version = 11 : i64} {
  func.func @_fused_netd_kernel(%arg0: i32, %arg1: memref<2x768xf32, #tpu.memory_space<vmem>>, %arg2: memref<768x512xf32, #tpu.memory_space<vmem>>, %arg3: memref<512x256xf32, #tpu.memory_space<vmem>>, %arg4: memref<256x16xf32, #tpu.memory_space<vmem>>, %arg5: memref<16x256xf32, #tpu.memory_space<vmem>>, %arg6: memref<1x16xf32, #tpu.memory_space<vmem>>, %arg7: memref<1x16xf32, #tpu.memory_space<vmem>>, %arg8: memref<256x1xf32, #tpu.memory_space<vmem>>, %arg9: memref<2x1xf32, #tpu.memory_space<vmem>>) attributes {dimension_semantics = [#tpu.dimension_semantics<arbitrary>], iteration_bounds = array<i64: 1>, scalar_prefetch = 0 : i64, scratch_operands = 0 : i64, tpu.core_type = #tpu.core_type<tc>, window_params = [{pipeline_mode = #tpu.pipeline_mode<synchronous>, transform_indices = @transform_0, window_bounds = array<i64: 2, 768>}, {pipeline_mode = #tpu.pipeline_mode<synchronous>, transform_indices = @transform_1, window_bounds = array<i64: 768, 512>}, {pipeline_mode = #tpu.pipeline_mode<synchronous>, transform_indices = @transform_2, window_bounds = array<i64: 512, 256>}, {pipeline_mode = #tpu.pipeline_mode<synchronous>, transform_indices = @transform_3, window_bounds = array<i64: 256, 16>}, {pipeline_mode = #tpu.pipeline_mode<synchronous>, transform_indices = @transform_4, window_bounds = array<i64: 16, 256>}, {pipeline_mode = #tpu.pipeline_mode<synchronous>, transform_indices = @transform_5, window_bounds = array<i64: 1, 16>}, {pipeline_mode = #tpu.pipeline_mode<synchronous>, transform_indices = @transform_6, window_bounds = array<i64: 1, 16>}, {pipeline_mode = #tpu.pipeline_mode<synchronous>, transform_indices = @transform_7, window_bounds = array<i64: 256, 1>}, {pipeline_mode = #tpu.pipeline_mode<synchronous>, transform_indices = @transform_8, window_bounds = array<i64: 2, 1>}]} {
    %c0 = arith.constant 0 : index
    %c0_0 = arith.constant 0 : index
    %0 = vector.load %arg1[%c0, %c0_0] : memref<2x768xf32, #tpu.memory_space<vmem>>, vector<2x768xf32>
    %c0_1 = arith.constant 0 : index
    %c0_2 = arith.constant 0 : index
    %1 = vector.load %arg2[%c0_1, %c0_2] : memref<768x512xf32, #tpu.memory_space<vmem>>, vector<768x512xf32>
    %cst = arith.constant dense<0.000000e+00> : vector<2x512xf32>
    %2 = tpu.matmul %0, %1, %cst {dimension_numbers = #tpu.dot_dimension_numbers<[1], [0], [0], [1], [0, 0, 1, 1], [], []>} : vector<2x768xf32>, vector<768x512xf32>, vector<2x512xf32> -> vector<2x512xf32>
    %cst_3 = arith.constant 2.000000e-01 : f32
    %3 = vector.broadcast %cst_3 : f32 to vector<2x512xf32>
    %4 = arith.mulf %3, %2 : vector<2x512xf32>
    %5 = arith.maximumf %2, %4 : vector<2x512xf32>
    %c0_4 = arith.constant 0 : index
    %c0_5 = arith.constant 0 : index
    %6 = vector.load %arg3[%c0_4, %c0_5] : memref<512x256xf32, #tpu.memory_space<vmem>>, vector<512x256xf32>
    %cst_6 = arith.constant dense<0.000000e+00> : vector<2x256xf32>
    %7 = tpu.matmul %5, %6, %cst_6 {dimension_numbers = #tpu.dot_dimension_numbers<[1], [0], [0], [1], [0, 0, 1, 1], [], []>} : vector<2x512xf32>, vector<512x256xf32>, vector<2x256xf32> -> vector<2x256xf32>
    %c0_7 = arith.constant 0 : index
    %c0_8 = arith.constant 0 : index
    %8 = vector.load %arg4[%c0_7, %c0_8] : memref<256x16xf32, #tpu.memory_space<vmem>>, vector<256x16xf32>
    %c0_9 = arith.constant 0 : index
    %c0_10 = arith.constant 0 : index
    %9 = vector.load %arg5[%c0_9, %c0_10] : memref<16x256xf32, #tpu.memory_space<vmem>>, vector<16x256xf32>
    %c0_11 = arith.constant 0 : index
    %c0_12 = arith.constant 0 : index
    %10 = vector.load %arg6[%c0_11, %c0_12] : memref<1x16xf32, #tpu.memory_space<vmem>>, vector<1x16xf32>
    %c0_13 = arith.constant 0 : index
    %c0_14 = arith.constant 0 : index
    %11 = vector.load %arg7[%c0_13, %c0_14] : memref<1x16xf32, #tpu.memory_space<vmem>>, vector<1x16xf32>
    %cst_15 = arith.constant dense<0.000000e+00> : vector<256xf32>
    %12 = vector.multi_reduction <add>, %7, %cst_15 [0] : vector<2x256xf32> to vector<256xf32>
    %13 = vector.shape_cast %12 : vector<256xf32> to vector<1x256xf32>
    %cst_16 = arith.constant dense<0.000000e+00> : vector<1x16xf32>
    %14 = tpu.matmul %13, %8, %cst_16 {dimension_numbers = #tpu.dot_dimension_numbers<[1], [0], [0], [1], [0, 0, 1, 1], [], []>} : vector<1x256xf32>, vector<256x16xf32>, vector<1x16xf32> -> vector<1x16xf32>
    %cst_17 = arith.constant 3.125000e-02 : f32
    %15 = vector.broadcast %cst_17 : f32 to vector<1x16xf32>
    %16 = arith.mulf %14, %15 : vector<1x16xf32>
    %cst_18 = arith.constant dense<0.000000e+00> : vector<1x256xf32>
    %17 = tpu.matmul %16, %9, %cst_18 {dimension_numbers = #tpu.dot_dimension_numbers<[1], [0], [0], [1], [0, 0, 1, 1], [], []>} : vector<1x16xf32>, vector<16x256xf32>, vector<1x256xf32> -> vector<1x256xf32>
    %18 = vector.broadcast %17 : vector<1x256xf32> to vector<2x256xf32>
    %19 = arith.subf %7, %18 : vector<2x256xf32>
    %20 = arith.mulf %19, %19 : vector<2x256xf32>
    %cst_19 = arith.constant dense<0.000000e+00> : vector<256xf32>
    %21 = vector.multi_reduction <add>, %20, %cst_19 [0] : vector<2x256xf32> to vector<256xf32>
    %22 = vector.shape_cast %21 : vector<256xf32> to vector<1x256xf32>
    %cst_20 = arith.constant dense<0.000000e+00> : vector<1x16xf32>
    %23 = tpu.matmul %22, %8, %cst_20 {dimension_numbers = #tpu.dot_dimension_numbers<[1], [0], [0], [1], [0, 0, 1, 1], [], []>} : vector<1x256xf32>, vector<256x16xf32>, vector<1x16xf32> -> vector<1x16xf32>
    %cst_21 = arith.constant 3.125000e-02 : f32
    %24 = vector.broadcast %cst_21 : f32 to vector<1x16xf32>
    %25 = arith.mulf %23, %24 : vector<1x16xf32>
    %cst_22 = arith.constant 9.99999974E-6 : f32
    %26 = vector.broadcast %cst_22 : f32 to vector<1x16xf32>
    %27 = arith.addf %25, %26 : vector<1x16xf32>
    %28 = math.rsqrt %27 : vector<1x16xf32>
    %29 = arith.mulf %10, %28 : vector<1x16xf32>
    %cst_23 = arith.constant dense<0.000000e+00> : vector<1x256xf32>
    %30 = tpu.matmul %29, %9, %cst_23 {dimension_numbers = #tpu.dot_dimension_numbers<[1], [0], [0], [1], [0, 0, 1, 1], [], []>} : vector<1x16xf32>, vector<16x256xf32>, vector<1x256xf32> -> vector<1x256xf32>
    %31 = vector.broadcast %30 : vector<1x256xf32> to vector<2x256xf32>
    %32 = arith.mulf %19, %31 : vector<2x256xf32>
    %cst_24 = arith.constant dense<0.000000e+00> : vector<1x256xf32>
    %33 = tpu.matmul %11, %9, %cst_24 {dimension_numbers = #tpu.dot_dimension_numbers<[1], [0], [0], [1], [0, 0, 1, 1], [], []>} : vector<1x16xf32>, vector<16x256xf32>, vector<1x256xf32> -> vector<1x256xf32>
    %34 = vector.broadcast %33 : vector<1x256xf32> to vector<2x256xf32>
    %35 = arith.addf %32, %34 : vector<2x256xf32>
    %cst_25 = arith.constant 2.000000e-01 : f32
    %36 = vector.broadcast %cst_25 : f32 to vector<2x256xf32>
    %37 = arith.mulf %36, %35 : vector<2x256xf32>
    %38 = arith.maximumf %35, %37 : vector<2x256xf32>
    %c0_26 = arith.constant 0 : index
    %c0_27 = arith.constant 0 : index
    %39 = vector.load %arg8[%c0_26, %c0_27] : memref<256x1xf32, #tpu.memory_space<vmem>>, vector<256x1xf32>
    %cst_28 = arith.constant dense<0.000000e+00> : vector<2x1xf32>
    %40 = tpu.matmul %38, %39, %cst_28 {dimension_numbers = #tpu.dot_dimension_numbers<[1], [0], [0], [1], [0, 0, 1, 1], [], []>} : vector<2x256xf32>, vector<256x1xf32>, vector<2x1xf32> -> vector<2x1xf32>
    %cst_29 = arith.constant 0.000000e+00 : f32
    %41 = vector.broadcast %cst_29 : f32 to vector<2x1xf32>
    %42 = arith.subf %41, %40 : vector<2x1xf32>
    %43 = math.exp %42 : vector<2x1xf32>
    %cst_30 = arith.constant 1.000000e+00 : f32
    %44 = vector.broadcast %cst_30 : f32 to vector<2x1xf32>
    %45 = arith.addf %44, %43 : vector<2x1xf32>
    %46 = tpu.reciprocal %45 {approx = true} : vector<2x1xf32> -> vector<2x1xf32>
    %c0_31 = arith.constant 0 : index
    %c0_32 = arith.constant 0 : index
    %47 = vector.load %arg9[%c0_31, %c0_32] : memref<2x1xf32, #tpu.memory_space<vmem>>, vector<2x1xf32>
    tpu.vector_store %arg9[%c0_31, %c0_32], %46 {strides = array<i32>} : memref<2x1xf32, #tpu.memory_space<vmem>>, vector<2x1xf32>,
    return
  }
  func.func @transform_0(%arg0: i32) -> (i32, i32) {
    %c0_i32 = arith.constant 0 : i32
    %c0_i32_0 = arith.constant 0 : i32
    %c0_i32_1 = arith.constant 0 : i32
    return %c0_i32, %c0_i32_0 : i32, i32
  }
  func.func @transform_1(%arg0: i32) -> (i32, i32) {
    %c0_i32 = arith.constant 0 : i32
    %c0_i32_0 = arith.constant 0 : i32
    %c0_i32_1 = arith.constant 0 : i32
    return %c0_i32, %c0_i32_0 : i32, i32
  }
  func.func @transform_2(%arg0: i32) -> (i32, i32) {
    %c0_i32 = arith.constant 0 : i32
    %c0_i32_0 = arith.constant 0 : i32
    %c0_i32_1 = arith.constant 0 : i32
    return %c0_i32, %c0_i32_0 : i32, i32
  }
  func.func @transform_3(%arg0: i32) -> (i32, i32) {
    %c0_i32 = arith.constant 0 : i32
    %c0_i32_0 = arith.constant 0 : i32
    %c0_i32_1 = arith.constant 0 : i32
    return %c0_i32, %c0_i32_0 : i32, i32
  }
  func.func @transform_4(%arg0: i32) -> (i32, i32) {
    %c0_i32 = arith.constant 0 : i32
    %c0_i32_0 = arith.constant 0 : i32
    %c0_i32_1 = arith.constant 0 : i32
    return %c0_i32, %c0_i32_0 : i32, i32
  }
  func.func @transform_5(%arg0: i32) -> (i32, i32) {
    %c0_i32 = arith.constant 0 : i32
    %c0_i32_0 = arith.constant 0 : i32
    %c0_i32_1 = arith.constant 0 : i32
    return %c0_i32, %c0_i32_0 : i32, i32
  }
  func.func @transform_6(%arg0: i32) -> (i32, i32) {
    %c0_i32 = arith.constant 0 : i32
    %c0_i32_0 = arith.constant 0 : i32
    %c0_i32_1 = arith.constant 0 : i32
    return %c0_i32, %c0_i32_0 : i32, i32
  }
  func.func @transform_7(%arg0: i32) -> (i32, i32) {
    %c0_i32 = arith.constant 0 : i32
    %c0_i32_0 = arith.constant 0 : i32
    %c0_i32_1 = arith.constant 0 : i32
    return %c0_i32, %c0_i32_0 : i32, i32
  }
  func.func @transform_8(%arg0: i32) -> (i32, i32) {
    %c0_i32 = arith.constant 0 : i32
    %c0_i32_0 = arith.constant 0 : i32
    %c0_i32_1 = arith.constant 0 : i32
    return %c0_i32, %c0_i32_0 : i32, i32
  }
}

</mosaic_0001>

<bundles_post_ra>
// kernel: tile.9
= control target key start
LH: loop header
LB: loop body
LE: loop exit
PB: predicated region body
PF: predicated region fallthrough
CT: control target
= control target key end

     0   :  { %s60_s6 = smov 3  ;;  %s63_s7 = smov 12  ;;  %vm65_vm0 = vcmask 1043458   ;;  %vm70_vm1 = vcmask 1045508   ;;  %vm75_vm2 = vcmask 1047558   ;;  %vm4_vm3 = vcmask 1047556   ;;  %s1502_s0 = inlined_call_operand.vmem [shape: f32[16,16,16], index: 0, kind: input, shape index: {}]   ;;  %s1503_s1 = inlined_call_operand.vmem [shape: f32[16,256], index: 1, kind: output, shape index: {}]  }
   0x1   :  { %v717_v0 = vld [vmem:[%s1502_s0 + $0x7] ss:$16 sm:%s60_s6]   ;;  %s68_s12 = smov 48  ;;  %s73_s13 = smov 192  ;;  %vm6_vm4 = vcmask 130048   ;;  %vm79_vm5 = vcmask 1048448  }
   0x2   :  { %v718_v1 = vld [vmem:[%s1502_s0 + $0x7] ss:$16 sm:%s63_s7]   ;;  %s105_s18 = smov 3  ;;  %s108_s21 = smov 12  ;;  %vm170_vm6 = vcmask 917248   ;;  %vm261_vm7 = vcmask 786048  }
   0x3   :  { %v66_v2 = vsel %vm65_vm0, %v718_v1, %v717_v0  ;;  %v719_v3 = vld [vmem:[%s1502_s0 + $0x7] ss:$16 sm:%s68_s12]   ;;  %s113_s22 = smov 48  ;;  %s118_s27 = smov 192  ;;  %vm352_vm8 = vcmask 654848   ;;  %vm443_vm9 = vcmask 523648  }
   0x4   :  { %v720_v4 = vld [vmem:[%s1502_s0 + $0x7] ss:$16 sm:%s73_s13]   ;;  %v71_v5 = vsel %vm70_vm1, %v719_v3, %v66_v2  ;;  %s82_s28 = smov 3  ;;  %s857_s29 = smov 112   ;;  %vm534_vm10 = vcmask 392448   ;;  %vm625_vm11 = vcmask 261248  }
   0x5   :  { %v726_v6 = vld [vmem:[%s1502_s0 + $0x87] ss:$16 sm:%s105_s18]   ;;  %v76_v7 = vsel %vm75_vm2, %v720_v4, %v71_v5  ;;  %s85_s3 = smov 12  ;;  %s90_s4 = smov 48  ;;  %v721_v13 = vld [vmem:[%s1502_s0 + $0xf] ss:$16 sm:%s82_s28]  }
   0x6   :  { %v727_v8 = vld [vmem:[%s1502_s0 + $0x87] ss:$16 sm:%s108_s21]   ;;  %77 = vrot.lane.b32.xlu0 %v76_v7, %s857_s29  ;;  %s95_s9 = smov 192  ;;  %s128_s10 = smov 3 }
   0x7   :  { %v728_v9 = vld [vmem:[%s1502_s0 + $0x87] ss:$16 sm:%s113_s22]   ;;  %v111_v10 = vsel %vm65_vm0, %v727_v8, %v726_v6  ;;  %v722_v14 = vld [vmem:[%s1502_s0 + $0xf] ss:$16 sm:%s85_s3]   ;;  %s131_s15 = smov 12  ;;  %s136_s16 = smov 48 }
   0x8   :  { %v729_v11 = vld [vmem:[%s1502_s0 + $0x87] ss:$16 sm:%s118_s27]   ;;  %v116_v12 = vsel %vm70_vm1, %v728_v9, %v111_v10  ;;  %v88_v16 = vsel %vm65_vm0, %v722_v14, %v721_v13  ;;  %v723_v17 = vld [vmem:[%s1502_s0 + $0xf] ss:$16 sm:%s90_s4]   ;;  %s141_s19 = smov 192  ;;  %s196_s24 = smov 3 }
   0x9   :  { %v121_v15 = vsel %vm75_vm2, %v729_v11, %v116_v12  ;;  %v724_v18 = vld [vmem:[%s1502_s0 + $0xf] ss:$16 sm:%s95_s9]   ;;  %v93_v19 = vsel %vm70_vm1, %v723_v17, %v88_v16  ;;  %s199_s25 = smov 12  ;;  %v745_v26 = vld [vmem:[%s1502_s0 + $0x86] ss:$16 sm:%s196_s24]   ;;  %s204_s2 = smov 48 }
   0xa   :  { %122 = vrot.lane.b32.xlu1 %v121_v15, %s857_s29  ;;  %v731_v20 = vld [vmem:[%s1502_s0 + $0x8f] ss:$16 sm:%s128_s10]   ;;  %v98_v23 = vsel %vm75_vm2, %v724_v18, %v93_v19  ;;  %s219_s5 = smov 3  ;;  %s222_s6 = smov 12 }
   0xb   :  { %v732_v21 = vld [vmem:[%s1502_s0 + $0x8f] ss:$16 sm:%s131_s15]   ;;  %v746_v28 = vld [vmem:[%s1502_s0 + $0x86] ss:$16 sm:%s199_s25]   ;;  %s209_s9 = smov 192  ;;  %s227_s12 = smov 48 }
   0xc   :  { %v733_v22 = vld [vmem:[%s1502_s0 + $0x8f] ss:$16 sm:%s136_s16]   ;;  %v134_v24 = vsel %vm65_vm0, %v732_v21, %v731_v20  ;;  %v202_v29 = vsel %vm65_vm0, %v746_v28, %v745_v26  ;;  %v747_v30 = vld [vmem:[%s1502_s0 + $0x86] ss:$16 sm:%s204_s2]   ;;  %s232_s15 = smov 192  ;;  %s264_s16 = smov 3 }
   0xd   :  { %v734_v25 = vld [vmem:[%s1502_s0 + $0x8f] ss:$16 sm:%s141_s19]   ;;  %v139_v27 = vsel %vm70_vm1, %v733_v22, %v134_v24  ;;  %v750_v31 = vld [vmem:[%s1502_s0 + $0x8e] ss:$16 sm:%s219_s5]   ;;  %s267_s17 = smov 12  ;;  %v207_v34 = vsel %vm70_vm1, %v747_v30, %v202_v29  ;;  %s272_s22 = smov 48 }
   0xe   :  { %99 = vrot.lane.b32.xlu0 %v98_v23, %s857_s29  ;;  %v144_v32 = vsel %vm75_vm2, %v734_v25, %v139_v27  ;;  %v751_v33 = vld [vmem:[%s1502_s0 + $0x8e] ss:$16 sm:%s222_s6]   ;;  %s151_s23 = smov 3  ;;  %s154_s27 = smov 12 }
   0xf   :  { %v748_v35 = vld [vmem:[%s1502_s0 + $0x86] ss:$16 sm:%s209_s9]   ;;  %v225_v36 = vsel %vm65_vm0, %v751_v33, %v750_v31  ;;  %v752_v37 = vld [vmem:[%s1502_s0 + $0x8e] ss:$16 sm:%s227_s12]   ;;  %s159_s28 = smov 48  ;;  %s164_s5 = smov 192 }
  0x10   :  { %v753_v38 = vld [vmem:[%s1502_s0 + $0x8e] ss:$16 sm:%s232_s15]   ;;  %v759_v39 = vld [vmem:[%s1502_s0 + $0xd] ss:$16 sm:%s264_s16]   ;;  %s287_s6 = smov 3  ;;  %v212_v42 = vsel %vm75_vm2, %v748_v35, %v207_v34  ;;  %v230_v43 = vsel %vm70_vm1, %v752_v37, %v225_v36  ;;  %s290_s11 = smov 12 }
  0x11   :  { %v760_v40 = vld [vmem:[%s1502_s0 + $0xd] ss:$16 sm:%s267_s17]   ;;  %v736_v41 = vld [vmem:[%s1502_s0 + $0x6] ss:$16 sm:%s151_s23]   ;;  %s277_s14 = smov 192  ;;  %s295_s21 = smov 48  ;;  %v235_v53 = vsel %vm75_vm2, %v753_v38, %v230_v43 }
  0x12   :  { %145 = vrot.lane.b32.xlu1 %v144_v32, %s857_s29  ;;  %v737_v44 = vld [vmem:[%s1502_s0 + $0x6] ss:$16 sm:%s154_s27]   ;;  %v270_v49 = vsel %vm65_vm0, %v760_v40, %v759_v39  ;;  %s858_s23 = smov 96   ;;  %s300_s29 = smov 192 }
  0x13   :  { %v738_v45 = vld [vmem:[%s1502_s0 + $0x6] ss:$16 sm:%s159_s28]   ;;  %v761_v46 = vld [vmem:[%s1502_s0 + $0xd] ss:$16 sm:%s272_s22]   ;;  %v157_v47 = vsel %vm65_vm0, %v737_v44, %v736_v41  ;;  %s333_s22 = smov 3  ;;  %s336_s24 = smov 12 }
  0x14   :  { %v739_v48 = vld [vmem:[%s1502_s0 + $0x6] ss:$16 sm:%s164_s5]   ;;  %v162_v50 = vsel %vm70_vm1, %v738_v45, %v157_v47  ;;  %v764_v51 = vld [vmem:[%s1502_s0 + $0x85] ss:$16 sm:%s287_s6]   ;;  %s173_s27 = smov 3  ;;  %s176_s28 = smov 12  ;;  %v275_v56 = vsel %vm70_vm1, %v761_v46, %v270_v49 }
  0x15   :  { %v765_v52 = vld [vmem:[%s1502_s0 + $0x85] ss:$16 sm:%s290_s11]   ;;  %v167_v54 = vsel %vm75_vm2, %v739_v48, %v162_v50  ;;  %v762_v55 = vld [vmem:[%s1502_s0 + $0xd] ss:$16 sm:%s277_s14]   ;;  %s181_s5 = smov 48  ;;  %s186_s6 = smov 192 }
  0x16   :  { %213 = vrot.lane.b32.xlu0 %v212_v42, %s858_s23  ;;  %168 = vrot.lane.b32.xlu2 %v167_v54, %s858_s23  ;;  %v293_v57 = vsel %vm65_vm0, %v765_v52, %v764_v51  ;;  %v766_v58 = vld [vmem:[%s1502_s0 + $0x85] ss:$16 sm:%s295_s21]   ;;  %s341_s11 = smov 48  ;;  %s355_s16 = smov 3  ;;  %v280_v0 = vsel %vm75_vm2, %v762_v55, %v275_v56 }
  0x17   :  { %v774_v59 = vld [vmem:[%s1502_s0 + $0x4] ss:$16 sm:%s333_s22]   ;;  %v767_v60 = vld [vmem:[%s1502_s0 + $0x85] ss:$16 sm:%s300_s29]   ;;  %s358_s17 = smov 12  ;;  %v298_v1 = vsel %vm70_vm1, %v766_v58, %v293_v57  ;;  %s346_s18 = smov 192 }
  0x18   :  { %v775_v61 = vld [vmem:[%s1502_s0 + $0x4] ss:$16 sm:%s336_s24]   ;;  %v740_v62 = vld [vmem:[%s1502_s0 + $0xe] ss:$16 sm:%s173_s27]   ;;  %s363_s25 = smov 48  ;;  %s401_s2 = smov 3  ;;  %v303_v11 = vsel %vm75_vm2, %v767_v60, %v298_v1 }
  0x19   :  { %v741_v63 = vld [vmem:[%s1502_s0 + $0xe] ss:$16 sm:%s176_s28]   ;;  %v776_v5 = vld [vmem:[%s1502_s0 + $0x4] ss:$16 sm:%s341_s11]   ;;  %v339_v7 = vsel %vm65_vm0, %v775_v61, %v774_v59  ;;  %s404_s3 = smov 12  ;;  %s859_s4 = smov 80  }
  0x1a   :  { %236 = vrot.lane.b32.xlu1 %v235_v53, %s858_s23  ;;  %v179_v2 = vsel %vm65_vm0, %v741_v63, %v740_v62  ;;  %v742_v3 = vld [vmem:[%s1502_s0 + $0xe] ss:$16 sm:%s181_s5]   ;;  %s242_s7 = smov 3  ;;  %s245_s9 = smov 12  ;;  %v344_v14 = vsel %vm70_vm1, %v776_v5, %v339_v7 }
  0x1b   :  { %v743_v4 = vld [vmem:[%s1502_s0 + $0xe] ss:$16 sm:%s186_s6]   ;;  %v184_v6 = vsel %vm70_vm1, %v742_v3, %v179_v2  ;;  %v778_v9 = vld [vmem:[%s1502_s0 + $0xc] ss:$16 sm:%s355_s16]   ;;  %s250_s10 = smov 48  ;;  %s368_s11 = smov 192 }
  0x1c   :  { %v189_v8 = vsel %vm75_vm2, %v743_v4, %v184_v6  ;;  %v779_v10 = vld [vmem:[%s1502_s0 + $0xc] ss:$16 sm:%s358_s17]   ;;  %v777_v12 = vld [vmem:[%s1502_s0 + $0x4] ss:$16 sm:%s346_s18]   ;;  %s255_s16 = smov 192  ;;  %s409_s17 = smov 48 }
  0x1d   :  { %v780_v13 = vld [vmem:[%s1502_s0 + $0xc] ss:$16 sm:%s363_s25]   ;;  %v361_v15 = vsel %vm65_vm0, %v779_v10, %v778_v9  ;;  %v755_v18 = vld [vmem:[%s1502_s0 + $0x5] ss:$16 sm:%s242_s7]   ;;  %s424_s24 = smov 3  ;;  %s427_s25 = smov 12  ;;  %v349_v21 = vsel %vm75_vm2, %v777_v12, %v344_v14 }
  0x1e   :  { %281 = vrot.lane.b32.xlu0 %v280_v0, %s859_s4  ;;  %190 = vrot.lane.b32.xlu2 %v189_v8, %s858_s23  ;;  %v788_v16 = vld [vmem:[%s1502_s0 + $0x8c] ss:$16 sm:%s401_s2]   ;;  %v366_v22 = vsel %vm70_vm1, %v780_v13, %v361_v15  ;;  %s414_s28 = smov 192  ;;  %s432_s6 = smov 48 }
  0x1f   :  { %v789_v17 = vld [vmem:[%s1502_s0 + $0x8c] ss:$16 sm:%s404_s3]   ;;  %v756_v19 = vld [vmem:[%s1502_s0 + $0x5] ss:$16 sm:%s245_s9]   ;;  %s469_s7 = smov 3  ;;  %s310_s12 = smov 3 }
  0x20   :  { %v757_v20 = vld [vmem:[%s1502_s0 + $0x5] ss:$16 sm:%s250_s10]   ;;  %v781_v23 = vld [vmem:[%s1502_s0 + $0xc] ss:$16 sm:%s368_s11]   ;;  %v248_v24 = vsel %vm65_vm0, %v756_v19, %v755_v18  ;;  %v407_v28 = vsel %vm65_vm0, %v789_v17, %v788_v16  ;;  %s472_s11 = smov 12  ;;  %s860_s13 = smov 64  }
  0x21   :  { %v758_v25 = vld [vmem:[%s1502_s0 + $0x5] ss:$16 sm:%s255_s16]   ;;  %v790_v26 = vld [vmem:[%s1502_s0 + $0x8c] ss:$16 sm:%s409_s17]   ;;  %v253_v27 = vsel %vm70_vm1, %v757_v20, %v248_v24  ;;  %v371_v32 = vsel %vm75_vm2, %v781_v23, %v366_v22  ;;  %s313_s16 = smov 12  ;;  %s318_s19 = smov 48 }
  0x22   :  { %304 = vrot.lane.b32.xlu1 %v303_v11, %s859_s4  ;;  %v258_v29 = vsel %vm75_vm2, %v758_v25, %v253_v27  ;;  %v793_v30 = vld [vmem:[%s1502_s0 + $0x3] ss:$16 sm:%s424_s24]   ;;  %s323_s20 = smov 192  ;;  %v412_v35 = vsel %vm70_vm1, %v790_v26, %v407_v28  ;;  %s437_s21 = smov 192 }
  0x23   :  { %v794_v31 = vld [vmem:[%s1502_s0 + $0x3] ss:$16 sm:%s427_s25]   ;;  %v791_v33 = vld [vmem:[%s1502_s0 + $0x8c] ss:$16 sm:%s414_s28]   ;;  %s477_s28 = smov 48  ;;  %s492_s23 = smov 3 }
  0x24   :  { %v795_v34 = vld [vmem:[%s1502_s0 + $0x3] ss:$16 sm:%s432_s6]   ;;  %v430_v36 = vsel %vm65_vm0, %v794_v31, %v793_v30  ;;  %v769_v39 = vld [vmem:[%s1502_s0 + $0x8d] ss:$16 sm:%s310_s12]   ;;  %s495_s8 = smov 12  ;;  %v417_v44 = vsel %vm75_vm2, %v791_v33, %v412_v35  ;;  %s500_s15 = smov 48 }
  0x25   :  { %v802_v37 = vld [vmem:[%s1502_s0 + $0x83] ss:$16 sm:%s469_s7]   ;;  %v770_v40 = vld [vmem:[%s1502_s0 + $0x8d] ss:$16 sm:%s313_s16]   ;;  %v435_v45 = vsel %vm70_vm1, %v795_v34, %v430_v36  ;;  %s537_s16 = smov 3  ;;  %s381_s22 = smov 12 }
  0x26   :  { %350 = vrot.lane.b32.xlu0 %v349_v21, %s860_s13  ;;  %259 = vrot.lane.b32.xlu2 %v258_v29, %s859_s4  ;;  %v803_v38 = vld [vmem:[%s1502_s0 + $0x83] ss:$16 sm:%s472_s11]   ;;  %v316_v41 = vsel %vm65_vm0, %v770_v40, %v769_v39  ;;  %s482_s11 = smov 192  ;;  %s386_s25 = smov 48 }
  0x27   :  { %v771_v42 = vld [vmem:[%s1502_s0 + $0x8d] ss:$16 sm:%s318_s19]   ;;  %v796_v46 = vld [vmem:[%s1502_s0 + $0x3] ss:$16 sm:%s437_s21]   ;;  %v475_v50 = vsel %vm65_vm0, %v803_v38, %v802_v37  ;;  %s378_s21 = smov 3  ;;  %s540_s27 = smov 12 }
  0x28   :  { %v772_v43 = vld [vmem:[%s1502_s0 + $0x8d] ss:$16 sm:%s323_s20]   ;;  %v321_v47 = vsel %vm70_vm1, %v771_v42, %v316_v41  ;;  %v804_v48 = vld [vmem:[%s1502_s0 + $0x83] ss:$16 sm:%s477_s28]   ;;  %v440_v53 = vsel %vm75_vm2, %v796_v46, %v435_v45  ;;  %s391_s28 = smov 192  ;;  %s505_s30 = smov 192 }
  0x29   :  { %v326_v49 = vsel %vm75_vm2, %v772_v43, %v321_v47  ;;  %v807_v51 = vld [vmem:[%s1502_s0 + $0x8b] ss:$16 sm:%s492_s23]   ;;  %v805_v54 = vld [vmem:[%s1502_s0 + $0x83] ss:$16 sm:%s482_s11]   ;;  %v480_v56 = vsel %vm70_vm1, %v804_v48, %v475_v50  ;;  %s545_s9 = smov 48  ;;  %s560_s17 = smov 3 }
  0x2a   :  { %372 = vrot.lane.b32.xlu1 %v371_v32, %s860_s13  ;;  %v808_v52 = vld [vmem:[%s1502_s0 + $0x8b] ss:$16 sm:%s495_s8]   ;;  %s861_s8 = smov 48   ;;  %s563_s18 = smov 12  ;;  %v485_v2 = vsel %vm75_vm2, %v805_v54, %v480_v56 }
  0x2b   :  { %v809_v55 = vld [vmem:[%s1502_s0 + $0x8b] ss:$16 sm:%s500_s15]   ;;  %v498_v57 = vsel %vm65_vm0, %v808_v52, %v807_v51  ;;  %v816_v58 = vld [vmem:[%s1502_s0 + $0xa] ss:$16 sm:%s537_s16]   ;;  %s454_s2 = smov 48  ;;  %s459_s23 = smov 192 }
  0x2c   :  { %v783_v59 = vld [vmem:[%s1502_s0 + $0x84] ss:$16 sm:%s378_s21]   ;;  %v817_v63 = vld [vmem:[%s1502_s0 + $0xa] ss:$16 sm:%s540_s27]   ;;  %v503_v3 = vsel %vm70_vm1, %v809_v55, %v498_v57  ;;  %s550_s21 = smov 192  ;;  %s573_s12 = smov 192 }
  0x2d   :  { %v784_v60 = vld [vmem:[%s1502_s0 + $0x84] ss:$16 sm:%s381_s22]   ;;  %v810_v4 = vld [vmem:[%s1502_s0 + $0x8b] ss:$16 sm:%s505_s30]   ;;  %s568_s22 = smov 48  ;;  %v543_v7 = vsel %vm65_vm0, %v817_v63, %v816_v58  ;;  %s449_s30 = smov 12 }
  0x2e   :  { %418 = vrot.lane.b32.xlu0 %v417_v44, %s860_s13  ;;  %327 = vrot.lane.b32.xlu2 %v326_v49, %s859_s4  ;;  %v384_v61 = vsel %vm65_vm0, %v784_v60, %v783_v59  ;;  %v785_v62 = vld [vmem:[%s1502_s0 + $0x84] ss:$16 sm:%s386_s25]   ;;  %s446_s25 = smov 3  ;;  %v508_v10 = vsel %vm75_vm2, %v810_v4, %v503_v3  ;;  %s631_s4 = smov 12 }
  0x2f   :  { %v389_v0 = vsel %vm70_vm1, %v785_v62, %v384_v61  ;;  %v786_v1 = vld [vmem:[%s1502_s0 + $0x84] ss:$16 sm:%s391_s28]   ;;  %v818_v5 = vld [vmem:[%s1502_s0 + $0xa] ss:$16 sm:%s545_s9]   ;;  %s609_s9 = smov 12  ;;  %s619_s28 = smov 192 }
  0x30   :  { %v394_v6 = vsel %vm75_vm2, %v786_v1, %v389_v0  ;;  %v821_v8 = vld [vmem:[%s1502_s0 + $0x82] ss:$16 sm:%s560_s17]   ;;  %v819_v11 = vld [vmem:[%s1502_s0 + $0xa] ss:$16 sm:%s550_s21]   ;;  %v548_v14 = vsel %vm70_vm1, %v818_v5, %v543_v7  ;;  %s518_s5 = smov 12  ;;  %s523_s10 = smov 48 }
  0x31   :  { %v822_v9 = vld [vmem:[%s1502_s0 + $0x82] ss:$16 sm:%s563_s18]   ;;  %v797_v13 = vld [vmem:[%s1502_s0 + $0xb] ss:$16 sm:%s446_s25]   ;;  %s614_s18 = smov 48  ;;  %s628_s25 = smov 3  ;;  %v553_v23 = vsel %vm75_vm2, %v819_v11, %v548_v14 }
  0x32   :  { %441 = vrot.lane.b32.xlu1 %v440_v53, %s861_s8  ;;  %v823_v12 = vld [vmem:[%s1502_s0 + $0x82] ss:$16 sm:%s568_s22]   ;;  %v566_v15 = vsel %vm65_vm0, %v822_v9, %v821_v8  ;;  %s862_s11 = smov 32   ;;  %s641_s15 = smov 192 }
  0x33   :  { %v798_v16 = vld [vmem:[%s1502_s0 + $0xb] ss:$16 sm:%s449_s30]   ;;  %v832_v21 = vld [vmem:[%s1502_s0 + $0x1] ss:$16 sm:%s609_s9]   ;;  %v571_v24 = vsel %vm70_vm1, %v823_v12, %v566_v15  ;;  %s515_s30 = smov 3  ;;  %s636_s9 = smov 48 }
  0x34   :  { %v799_v17 = vld [vmem:[%s1502_s0 + $0xb] ss:$16 sm:%s454_s2]   ;;  %v452_v18 = vsel %vm65_vm0, %v798_v16, %v797_v13  ;;  %v824_v25 = vld [vmem:[%s1502_s0 + $0x82] ss:$16 sm:%s573_s12]   ;;  %s677_s19 = smov 12  ;;  %s586_s26 = smov 12 }
  0x35   :  { %v800_v19 = vld [vmem:[%s1502_s0 + $0xb] ss:$16 sm:%s459_s23]   ;;  %v457_v22 = vsel %vm70_vm1, %v799_v17, %v452_v18  ;;  %v833_v26 = vld [vmem:[%s1502_s0 + $0x1] ss:$16 sm:%s614_s18]   ;;  %v576_v31 = vsel %vm75_vm2, %v824_v25, %v571_v24  ;;  %s528_s18 = smov 192  ;;  %s682_s23 = smov 48 }
  0x36   :  { %486 = vrot.lane.b32.xlu0 %v485_v2, %s861_s8  ;;  %395 = vrot.lane.b32.xlu2 %v394_v6, %s860_s13  ;;  %s606_s13 = smov 3  ;;  %v462_v27 = vsel %vm75_vm2, %v800_v19, %v457_v22  ;;  %v835_v29 = vld [vmem:[%s1502_s0 + $0x9] ss:$16 sm:%s628_s25]   ;;  %s591_s14 = smov 48 }
  0x37   :  { %v831_v20 = vld [vmem:[%s1502_s0 + $0x1] ss:$16 sm:%s606_s13]   ;;  %v836_v30 = vld [vmem:[%s1502_s0 + $0x9] ss:$16 sm:%s631_s4]   ;;  %s583_s4 = smov 3  ;;  %s687_s17 = smov 192 }
  0x38   :  { %v612_v28 = vsel %vm65_vm0, %v832_v21, %v831_v20  ;;  %v834_v32 = vld [vmem:[%s1502_s0 + $0x1] ss:$16 sm:%s619_s28]   ;;  %v812_v33 = vld [vmem:[%s1502_s0 + $0x2] ss:$16 sm:%s515_s30]   ;;  %v634_v36 = vsel %vm65_vm0, %v836_v30, %v835_v29  ;;  %s596_s20 = smov 192  ;;  %s651_s29 = smov 3 }
  0x39   :  { %v813_v34 = vld [vmem:[%s1502_s0 + $0x2] ss:$16 sm:%s518_s5]   ;;  %v617_v35 = vsel %vm70_vm1, %v833_v26, %v612_v28  ;;  %v837_v37 = vld [vmem:[%s1502_s0 + $0x9] ss:$16 sm:%s636_s9]   ;;  %s654_s24 = smov 12  ;;  %s659_s2 = smov 48 }
  0x3a   :  { %509 = vrot.lane.b32.xlu1 %v508_v10, %s861_s8  ;;  %v521_v38 = vsel %vm65_vm0, %v813_v34, %v812_v33  ;;  %v814_v39 = vld [vmem:[%s1502_s0 + $0x2] ss:$16 sm:%s523_s10]   ;;  %v622_v45 = vsel %vm75_vm2, %v834_v32, %v617_v35  ;;  %v639_v46 = vsel %vm70_vm1, %v837_v37, %v634_v36  ;;  %s664_s6 = smov 192  ;;  %v2_v4 = vld [vmem:[%s1502_s0] ss:$8 sm:$0xf]  }
  0x3b   :  { %v838_v40 = vld [vmem:[%s1502_s0 + $0x9] ss:$16 sm:%s641_s15]   ;;  %v526_v41 = vsel %vm70_vm1, %v814_v39, %v521_v38  ;;  %v815_v42 = vld [vmem:[%s1502_s0 + $0x2] ss:$16 sm:%s528_s18]   ;;  %s863_s18 = smov 16  }
  0x3c   :  { %v846_v44 = vld [vmem:[%s1502_s0 + $0x89] ss:$16 sm:%s677_s19]   ;;  %v826_v47 = vld [vmem:[%s1502_s0 + $0x8a] ss:$16 sm:%s583_s4]   ;;  %v531_v49 = vsel %vm75_vm2, %v815_v42, %v526_v41  ;;  %v644_v52 = vsel %vm75_vm2, %v838_v40, %v639_v46 }
  0x3d   :  { %v827_v48 = vld [vmem:[%s1502_s0 + $0x8a] ss:$16 sm:%s586_s26]   ;;  %v847_v51 = vld [vmem:[%s1502_s0 + $0x89] ss:$16 sm:%s682_s23]  }
  0x3e   :  { %554 = vrot.lane.b32.xlu0 %v553_v23, %s862_s11  ;;  %463 = vrot.lane.b32.xlu2 %v462_v27, %s861_s8  ;;  %s674_s8 = smov 3  ;;  %v589_v53 = vsel %vm65_vm0, %v827_v48, %v826_v47  ;;  %v828_v54 = vld [vmem:[%s1502_s0 + $0x8a] ss:$16 sm:%s591_s14]  }
  0x3f   :  { %v845_v43 = vld [vmem:[%s1502_s0 + $0x89] ss:$16 sm:%s674_s8]   ;;  %v594_v57 = vsel %vm70_vm1, %v828_v54, %v589_v53  ;;  %v829_v58 = vld [vmem:[%s1502_s0 + $0x8a] ss:$16 sm:%s596_s20]  }
  0x40   :  { %v680_v50 = vsel %vm65_vm0, %v846_v44, %v845_v43  ;;  %v848_v56 = vld [vmem:[%s1502_s0 + $0x89] ss:$16 sm:%s687_s17]   ;;  %v840_v60 = vld [vmem:[%s1502_s0 + $0x81] ss:$16 sm:%s651_s29]   ;;  %v599_v62 = vsel %vm75_vm2, %v829_v58, %v594_v57 }
  0x41   :  { %v685_v55 = vsel %vm70_vm1, %v847_v51, %v680_v50  ;;  %v841_v61 = vld [vmem:[%s1502_s0 + $0x81] ss:$16 sm:%s654_s24]   ;;  %v3_v5 = vld [vmem:[%s1502_s0] ss:$8 sm:$0xf0]  }
  0x42   :  { %577 = vrot.lane.b32.xlu1 %v576_v31, %s862_s11  ;;  %v690_v59 = vsel %vm75_vm2, %v848_v56, %v685_v55  ;;  %v657_v63 = vsel %vm65_vm0, %v841_v61, %v840_v60  ;;  %v842_v0 = vld [vmem:[%s1502_s0 + $0x81] ss:$16 sm:%s659_s2]   ;;  %v5_v6 = vsel %vm4_vm3, %v3_v5, %v2_v4  ;;  %v699_v7 = vld [vmem:[%s1502_s0 + $0x40] ss:$8 sm:$0xf]  }
  0x43   :  { %v662_v1 = vsel %vm70_vm1, %v842_v0, %v657_v63  ;;  %v843_v2 = vld [vmem:[%s1502_s0 + $0x81] ss:$16 sm:%s664_s6]   ;;  %7 = vst.msk [vmem:[%s1503_s1] ss:$8 sm:$0x3] %vm6_vm4, %v5_v6  }
  0x44   :  { %v667_v3 = vsel %vm75_vm2, %v843_v2, %v662_v1  ;;  %v700_v8 = vld [vmem:[%s1502_s0 + $0x40] ss:$8 sm:$0xf0]   ;;  %696 = vst.msk [vmem:[%s1503_s1 - $0xf] ss:$8 sm:$0xc] %vm6_vm4, %v5_v6  }
  0x45   :  { %v19_v9 = vsel %vm4_vm3, %v700_v8, %v699_v7  ;;  %697 = vst.msk [vmem:[%s1503_s1 - $0x1e] ss:$8 sm:$0x30] %vm6_vm4, %v5_v6   ;;  %v705_v10 = vld [vmem:[%s1502_s0 + $0x80] ss:$8 sm:$0xf]  }
  0x46   :  { %623 = vrot.lane.b32.xlu0 %v622_v45, %s863_s18  ;;  %532 = vrot.lane.b32.xlu2 %v531_v49, %s862_s11  ;;  %698 = vst.msk [vmem:[%s1503_s1 - $0x2d] ss:$8 sm:$0xc0] %vm6_vm4, %v5_v6   ;;  %v706_v11 = vld [vmem:[%s1502_s0 + $0x80] ss:$8 sm:$0xf0]  }
  0x47   :  { %701 = vst.msk [vmem:[%s1503_s1 + $0x4] ss:$8 sm:$0x3] %vm6_vm4, %v19_v9   ;;  %v34_v12 = vsel %vm4_vm3, %v706_v11, %v705_v10  ;;  %v711_v13 = vld [vmem:[%s1502_s0 + $0xc0] ss:$8 sm:$0xf]  }
  0x48   :  { %702 = vst.msk [vmem:[%s1503_s1 - $0xb] ss:$8 sm:$0xc] %vm6_vm4, %v19_v9   ;;  %v712_v14 = vld [vmem:[%s1502_s0 + $0xc0] ss:$8 sm:$0xf0]  }
  0x49   :  { %703 = vst.msk [vmem:[%s1503_s1 - $0x1a] ss:$8 sm:$0x30] %vm6_vm4, %v19_v9   ;;  %v49_v15 = vsel %vm4_vm3, %v712_v14, %v711_v13 }
  0x4a   :  { %645 = vrot.lane.b32.xlu1 %v644_v52, %s863_s18  ;;  %704 = vst.msk [vmem:[%s1503_s1 - $0x29] ss:$8 sm:$0xc0] %vm6_vm4, %v19_v9  }
  0x4b   :  { %707 = vst.msk [vmem:[%s1503_s1 + $0x10] ss:$8 sm:$0x3] %vm6_vm4, %v34_v12  }
  0x4c   :  { %708 = vst.msk [vmem:[%s1503_s1 + $0x1] ss:$8 sm:$0xc] %vm6_vm4, %v34_v12  }
  0x4d   :  { %709 = vst.msk [vmem:[%s1503_s1 - $0xe] ss:$8 sm:$0x30] %vm6_vm4, %v34_v12  }
  0x4e   :  { %691 = vrot.lane.b32.xlu0 %v690_v59, %s863_s18  ;;  %600 = vrot.lane.b32.xlu2 %v599_v62, %s862_s11  ;;  %710 = vst.msk [vmem:[%s1503_s1 - $0x1d] ss:$8 sm:$0xc0] %vm6_vm4, %v34_v12  }
  0x4f   :  { %713 = vst.msk [vmem:[%s1503_s1 + $0x14] ss:$8 sm:$0x3] %vm6_vm4, %v49_v15  }
  0x50   :  { %714 = vst.msk [vmem:[%s1503_s1 + $0x5] ss:$8 sm:$0xc] %vm6_vm4, %v49_v15  }
  0x51   :  { %715 = vst.msk [vmem:[%s1503_s1 - $0xa] ss:$8 sm:$0x30] %vm6_vm4, %v49_v15  }
  0x52   :  { %716 = vst.msk [vmem:[%s1503_s1 - $0x19] ss:$8 sm:$0xc0] %vm6_vm4, %v49_v15  }
  0x56   :  { %668 = vrot.lane.b32.xlu2 %v667_v3, %s863_s18 }
  0x70   :  { %v169_v16 = vpop.permute.xlu2 %168  }
  0x78   :  { %v78_v17 = vpop.permute.xlu0 %77   ;;  %v191_v18 = vpop.permute.xlu2 %190  }
  0x79   :  { %80 = vst.msk [vmem:[%s1503_s1] sm:$0xff] %vm79_vm5, %v78_v17  }
  0x7a   :  { %171 = vst.msk [vmem:[%s1503_s1] sm:$0xff] %vm170_vm6, %v169_v16  }
  0x7c   :  { %v123_v19 = vpop.permute.xlu1 %122  }
  0x7d   :  { %730 = vst.msk [vmem:[%s1503_s1 + $0x10] sm:$0xff] %vm79_vm5, %v123_v19  }
  0x80   :  { %v100_v20 = vpop.permute.xlu0 %99   ;;  %v260_v21 = vpop.permute.xlu2 %259  }
  0x81   :  { %725 = vst.msk [vmem:[%s1503_s1 + $0x8] sm:$0xff] %vm79_vm5, %v100_v20  }
  0x82   :  { %744 = vst.msk [vmem:[%s1503_s1 + $0x8] sm:$0xff] %vm170_vm6, %v191_v18  }
  0x83   :  { %262 = vst.msk [vmem:[%s1503_s1] sm:$0xff] %vm261_vm7, %v260_v21  }
  0x84   :  { %v146_v22 = vpop.permute.xlu1 %145  }
  0x85   :  { %735 = vst.msk [vmem:[%s1503_s1 + $0x18] sm:$0xff] %vm79_vm5, %v146_v22  }
  0x88   :  { %v214_v23 = vpop.permute.xlu0 %213   ;;  %v328_v24 = vpop.permute.xlu2 %327  }
  0x89   :  { %749 = vst.msk [vmem:[%s1503_s1 + $0x10] sm:$0xff] %vm170_vm6, %v214_v23  }
  0x8c   :  { %v237_v25 = vpop.permute.xlu1 %236  }
  0x8d   :  { %754 = vst.msk [vmem:[%s1503_s1 + $0x18] sm:$0xff] %vm170_vm6, %v237_v25  }
  0x8e   :  { %773 = vst.msk [vmem:[%s1503_s1 + $0x18] sm:$0xff] %vm261_vm7, %v328_v24  }
  0x90   :  { %v282_v26 = vpop.permute.xlu0 %281   ;;  %v396_v27 = vpop.permute.xlu2 %395  }
  0x91   :  { %763 = vst.msk [vmem:[%s1503_s1 + $0x8] sm:$0xff] %vm261_vm7, %v282_v26  }
  0x94   :  { %v305_v28 = vpop.permute.xlu1 %304  }
  0x95   :  { %768 = vst.msk [vmem:[%s1503_s1 + $0x10] sm:$0xff] %vm261_vm7, %v305_v28  }
  0x96   :  { %787 = vst.msk [vmem:[%s1503_s1 + $0x10] sm:$0xff] %vm352_vm8, %v396_v27  }
  0x98   :  { %v351_v29 = vpop.permute.xlu0 %350   ;;  %v464_v30 = vpop.permute.xlu2 %463  }
  0x99   :  { %353 = vst.msk [vmem:[%s1503_s1] sm:$0xff] %vm352_vm8, %v351_v29  }
  0x9c   :  { %v373_v31 = vpop.permute.xlu1 %372  }
  0x9d   :  { %782 = vst.msk [vmem:[%s1503_s1 + $0x8] sm:$0xff] %vm352_vm8, %v373_v31  }
  0x9e   :  { %801 = vst.msk [vmem:[%s1503_s1 + $0x8] sm:$0xff] %vm443_vm9, %v464_v30  }
  0xa0   :  { %v419_v32 = vpop.permute.xlu0 %418   ;;  %v533_v33 = vpop.permute.xlu2 %532  }
  0xa1   :  { %792 = vst.msk [vmem:[%s1503_s1 + $0x18] sm:$0xff] %vm352_vm8, %v419_v32  }
  0xa4   :  { %v442_v34 = vpop.permute.xlu1 %441  }
  0xa5   :  { %444 = vst.msk [vmem:[%s1503_s1] sm:$0xff] %vm443_vm9, %v442_v34  }
  0xa6   :  { %535 = vst.msk [vmem:[%s1503_s1] sm:$0xff] %vm534_vm10, %v533_v33  }
  0xa8   :  { %v487_v35 = vpop.permute.xlu0 %486   ;;  %v601_v36 = vpop.permute.xlu2 %600  }
  0xa9   :  { %806 = vst.msk [vmem:[%s1503_s1 + $0x10] sm:$0xff] %vm443_vm9, %v487_v35  }
  0xac   :  { %v510_v37 = vpop.permute.xlu1 %509  }
  0xad   :  { %811 = vst.msk [vmem:[%s1503_s1 + $0x18] sm:$0xff] %vm443_vm9, %v510_v37  }
  0xae   :  { %830 = vst.msk [vmem:[%s1503_s1 + $0x18] sm:$0xff] %vm534_vm10, %v601_v36  }
  0xb0   :  { %v555_v38 = vpop.permute.xlu0 %554   ;;  %v669_v39 = vpop.permute.xlu2 %668  }
  0xb1   :  { %820 = vst.msk [vmem:[%s1503_s1 + $0x8] sm:$0xff] %vm534_vm10, %v555_v38  }
  0xb4   :  { %v578_v40 = vpop.permute.xlu1 %577  }
  0xb5   :  { %825 = vst.msk [vmem:[%s1503_s1 + $0x10] sm:$0xff] %vm534_vm10, %v578_v40  }
  0xb6   :  { %844 = vst.msk [vmem:[%s1503_s1 + $0x10] sm:$0xff] %vm625_vm11, %v669_v39  }
  0xb8   :  { %v624_v41 = vpop.permute.xlu0 %623  }
  0xb9   :  { %626 = vst.msk [vmem:[%s1503_s1] sm:$0xff] %vm625_vm11, %v624_v41  }
  0xbc   :  { %v646_v42 = vpop.permute.xlu1 %645  }
  0xbd   :  { %839 = vst.msk [vmem:[%s1503_s1 + $0x8] sm:$0xff] %vm625_vm11, %v646_v42  }
  0xc0   :  { %v692_v43 = vpop.permute.xlu0 %691  }
  0xc1   :  { %849 = vst.msk [vmem:[%s1503_s1 + $0x18] sm:$0xff] %vm625_vm11, %v692_v43  }

// kernel: _lambda_.1
= control target key start
LH: loop header
LB: loop body
LE: loop exit
PB: predicated region body
PF: predicated region fallthrough
CT: control target
= control target key end

     0   :  { %vm1246_vm0 = vcmask 1041408   ;;  %vm1302_vm1 = vcmask 130048   ;;  %vm1594_vm5 = vcmask 1024   ;;  %s3476_s1 = inlined_call_operand.vmem [shape: f32[768,512], index: 1, kind: input, shape index: {}]   ;;  %s3477_s0 = inlined_call_operand.vmem [shape: f32[2,768], index: 0, kind: input, shape index: {}]   ;;  %s3478_s2 = inlined_call_operand.vmem [shape: f32[512,256], index: 2, kind: input, shape index: {}]   ;;  %s3479_s3 = inlined_call_operand.vmem [shape: f32[256,16], index: 3, kind: input, shape index: {}]   ;;  %s3480_s4 = inlined_call_operand.vmem [shape: f32[16,256], index: 4, kind: input, shape index: {}]   ;;  %s3481_s7 = inlined_call_operand.vmem [shape: f32[256,1], index: 7, kind: input, shape index: {}]   ;;  %s3482_s5 = inlined_call_operand.vmem [shape: f32[1,16], index: 5, kind: input, shape index: {}]   ;;  %s3483_s6 = inlined_call_operand.vmem [shape: f32[1,16], index: 6, kind: input, shape index: {}]   ;;  %s3484_s8 = inlined_call_operand.vmem [shape: f32[2,1], index: 8, kind: output, shape index: {}]  }
   0x1   :  { %v91_v0 = vld [vmem:[%s3476_s1 + $0x1e0] sm:$0xff] }
   0x2   :  { %v155_v1 = vld [vmem:[%s3476_s1 + $0x3e0] sm:$0xff]  ;;  %432 = vmatpush.msra.mxu0 %v91_v0 }
   0x3   :  { %v219_v2 = vld [vmem:[%s3476_s1 + $0x5e0] sm:$0xff]  ;;  %452 = vmatpush.msra.mxu1 %v155_v1  ;;  %v92_v1 = vld [vmem:[%s3476_s1 + $0x1e8] sm:$0xff] }
   0x4   :  { %v87_v3 = vld [vmem:[%s3476_s1 + $0x1c0] sm:$0xff]  ;;  %472 = vmatpush.msra.mxu2 %v219_v2 }
   0x5   :  { %v151_v4 = vld [vmem:[%s3476_s1 + $0x3c0] sm:$0xff]  ;;  %433 = vmatpush.msra.mxu0 %v87_v3 }
   0x6   :  { %v215_v5 = vld [vmem:[%s3476_s1 + $0x5c0] sm:$0xff]  ;;  %453 = vmatpush.msra.mxu1 %v151_v4 }
   0x7   :  { %v283_v6 = vld [vmem:[%s3476_s1 + $0x7e0] sm:$0xff]  ;;  %473 = vmatpush.msra.mxu2 %v215_v5  ;;  %v88_v5 = vld [vmem:[%s3476_s1 + $0x1c8] sm:$0xff] }
   0x8   :  { %v83_v7 = vld [vmem:[%s3476_s1 + $0x1a0] sm:$0xff]  ;;  %492 = vmatpush.msra.mxu3 %v283_v6  ;;  %v156_v6 = vld [vmem:[%s3476_s1 + $0x3e8] sm:$0xff] }
   0x9   :  { %v147_v8 = vld [vmem:[%s3476_s1 + $0x3a0] sm:$0xff]  ;;  %434 = vmatpush.msra.mxu0 %v83_v7 }
   0xa   :  { %v211_v9 = vld [vmem:[%s3476_s1 + $0x5a0] sm:$0xff]  ;;  %454 = vmatpush.msra.mxu1 %v147_v8 }
   0xb   :  { %v279_v10 = vld [vmem:[%s3476_s1 + $0x7c0] sm:$0xff]  ;;  %474 = vmatpush.msra.mxu2 %v211_v9  ;;  %v84_v9 = vld [vmem:[%s3476_s1 + $0x1a8] sm:$0xff] }
   0xc   :  { %v79_v11 = vld [vmem:[%s3476_s1 + $0x180] sm:$0xff]  ;;  %493 = vmatpush.msra.mxu3 %v279_v10  ;;  %v152_v10 = vld [vmem:[%s3476_s1 + $0x3c8] sm:$0xff] }
   0xd   :  { %v143_v12 = vld [vmem:[%s3476_s1 + $0x380] sm:$0xff]  ;;  %435 = vmatpush.msra.mxu0 %v79_v11 }
   0xe   :  { %v207_v13 = vld [vmem:[%s3476_s1 + $0x580] sm:$0xff]  ;;  %455 = vmatpush.msra.mxu1 %v143_v12 }
   0xf   :  { %v275_v14 = vld [vmem:[%s3476_s1 + $0x7a0] sm:$0xff]  ;;  %475 = vmatpush.msra.mxu2 %v207_v13  ;;  %v80_v13 = vld [vmem:[%s3476_s1 + $0x188] sm:$0xff] }
  0x10   :  { %v75_v15 = vld [vmem:[%s3476_s1 + $0x160] sm:$0xff]  ;;  %494 = vmatpush.msra.mxu3 %v275_v14  ;;  %v148_v14 = vld [vmem:[%s3476_s1 + $0x3a8] sm:$0xff] }
  0x11   :  { %v139_v16 = vld [vmem:[%s3476_s1 + $0x360] sm:$0xff]  ;;  %436 = vmatpush.msra.mxu0 %v75_v15 }
  0x12   :  { %v203_v17 = vld [vmem:[%s3476_s1 + $0x560] sm:$0xff]  ;;  %456 = vmatpush.msra.mxu1 %v139_v16 }
  0x13   :  { %v271_v18 = vld [vmem:[%s3476_s1 + $0x780] sm:$0xff]  ;;  %476 = vmatpush.msra.mxu2 %v203_v17  ;;  %v76_v17 = vld [vmem:[%s3476_s1 + $0x168] sm:$0xff] }
  0x14   :  { %v71_v19 = vld [vmem:[%s3476_s1 + $0x140] sm:$0xff]  ;;  %495 = vmatpush.msra.mxu3 %v271_v18  ;;  %v144_v18 = vld [vmem:[%s3476_s1 + $0x388] sm:$0xff] }
  0x15   :  { %v135_v20 = vld [vmem:[%s3476_s1 + $0x340] sm:$0xff]  ;;  %437 = vmatpush.msra.mxu0 %v71_v19 }
  0x16   :  { %v199_v21 = vld [vmem:[%s3476_s1 + $0x540] sm:$0xff]  ;;  %457 = vmatpush.msra.mxu1 %v135_v20 }
  0x17   :  { %v267_v22 = vld [vmem:[%s3476_s1 + $0x760] sm:$0xff]  ;;  %477 = vmatpush.msra.mxu2 %v199_v21 }
  0x18   :  { %v67_v23 = vld [vmem:[%s3476_s1 + $0x120] sm:$0xff]  ;;  %496 = vmatpush.msra.mxu3 %v267_v22  ;;  %v72_v22 = vld [vmem:[%s3476_s1 + $0x148] sm:$0xff] }
  0x19   :  { %v131_v24 = vld [vmem:[%s3476_s1 + $0x320] sm:$0xff]  ;;  %438 = vmatpush.msra.mxu0 %v67_v23  ;;  %v140_v23 = vld [vmem:[%s3476_s1 + $0x368] sm:$0xff] }
  0x1a   :  { %v195_v25 = vld [vmem:[%s3476_s1 + $0x520] sm:$0xff]  ;;  %458 = vmatpush.msra.mxu1 %v131_v24 }
  0x1b   :  { %v263_v26 = vld [vmem:[%s3476_s1 + $0x740] sm:$0xff]  ;;  %478 = vmatpush.msra.mxu2 %v195_v25 }
  0x1c   :  { %v63_v27 = vld [vmem:[%s3476_s1 + $0x100] sm:$0xff]  ;;  %497 = vmatpush.msra.mxu3 %v263_v26  ;;  %v68_v26 = vld [vmem:[%s3476_s1 + $0x128] sm:$0xff] }
  0x1d   :  { %v127_v28 = vld [vmem:[%s3476_s1 + $0x300] sm:$0xff]  ;;  %439 = vmatpush.msra.mxu0 %v63_v27  ;;  %v136_v27 = vld [vmem:[%s3476_s1 + $0x348] sm:$0xff] }
  0x1e   :  { %v191_v29 = vld [vmem:[%s3476_s1 + $0x500] sm:$0xff]  ;;  %459 = vmatpush.msra.mxu1 %v127_v28 }
  0x1f   :  { %v259_v30 = vld [vmem:[%s3476_s1 + $0x720] sm:$0xff]  ;;  %479 = vmatpush.msra.mxu2 %v191_v29 }
  0x20   :  { %v59_v31 = vld [vmem:[%s3476_s1 + $0xe0] sm:$0xff]  ;;  %498 = vmatpush.msra.mxu3 %v259_v30  ;;  %v64_v30 = vld [vmem:[%s3476_s1 + $0x108] sm:$0xff] }
  0x21   :  { %v123_v32 = vld [vmem:[%s3476_s1 + $0x2e0] sm:$0xff]  ;;  %440 = vmatpush.msra.mxu0 %v59_v31  ;;  %v132_v31 = vld [vmem:[%s3476_s1 + $0x328] sm:$0xff] }
  0x22   :  { %v187_v33 = vld [vmem:[%s3476_s1 + $0x4e0] sm:$0xff]  ;;  %460 = vmatpush.msra.mxu1 %v123_v32 }
  0x23   :  { %v255_v34 = vld [vmem:[%s3476_s1 + $0x700] sm:$0xff]  ;;  %480 = vmatpush.msra.mxu2 %v187_v33 }
  0x24   :  { %v55_v35 = vld [vmem:[%s3476_s1 + $0xc0] sm:$0xff]  ;;  %499 = vmatpush.msra.mxu3 %v255_v34  ;;  %v30_v34 = vld [vmem:[%s3477_s0 + $0x8] sm:$0xf] }
  0x25   :  { %v119_v36 = vld [vmem:[%s3476_s1 + $0x2c0] sm:$0xff]  ;;  %441 = vmatpush.msra.mxu0 %v55_v35  ;;  %v60_v35 = vld [vmem:[%s3476_s1 + $0xe8] sm:$0xff]  ;;  %419 = vst [vmem:[#allocation1 + $0x20] ss:$4 sm:$0xff] %v30_v34 }
  0x26   :  { %v183_v37 = vld [vmem:[%s3476_s1 + $0x4c0] sm:$0xff]  ;;  %461 = vmatpush.msra.mxu1 %v119_v36  ;;  %v128_v36 = vld [vmem:[%s3476_s1 + $0x308] sm:$0xff] }
  0x27   :  { %v251_v38 = vld [vmem:[%s3476_s1 + $0x6e0] sm:$0xff]  ;;  %481 = vmatpush.msra.mxu2 %v183_v37  ;;  %v392_v34 = vld [vmem:[%s3476_s1 + $0xb48] sm:$0xff] }
  0x28   :  { %v51_v39 = vld [vmem:[%s3476_s1 + $0xa0] sm:$0xff]  ;;  %500 = vmatpush.msra.mxu3 %v251_v38 }
  0x29   :  { %v115_v40 = vld [vmem:[%s3476_s1 + $0x2a0] sm:$0xff]  ;;  %442 = vmatpush.msra.mxu0 %v51_v39  ;;  %v56_v39 = vld [vmem:[%s3476_s1 + $0xc8] sm:$0xff] }
  0x2a   :  { %v179_v41 = vld [vmem:[%s3476_s1 + $0x4a0] sm:$0xff]  ;;  %462 = vmatpush.msra.mxu1 %v115_v40  ;;  %v124_v40 = vld [vmem:[%s3476_s1 + $0x2e8] sm:$0xff] }
  0x2b   :  { %v247_v42 = vld [vmem:[%s3476_s1 + $0x6c0] sm:$0xff]  ;;  %482 = vmatpush.msra.mxu2 %v179_v41 }
  0x2c   :  { %v47_v43 = vld [vmem:[%s3476_s1 + $0x80] sm:$0xff]  ;;  %501 = vmatpush.msra.mxu3 %v247_v42 }
  0x2d   :  { %v111_v44 = vld [vmem:[%s3476_s1 + $0x280] sm:$0xff]  ;;  %443 = vmatpush.msra.mxu0 %v47_v43  ;;  %v52_v43 = vld [vmem:[%s3476_s1 + $0xa8] sm:$0xff] }
  0x2e   :  { %v175_v45 = vld [vmem:[%s3476_s1 + $0x480] sm:$0xff]  ;;  %463 = vmatpush.msra.mxu1 %v111_v44  ;;  %v120_v44 = vld [vmem:[%s3476_s1 + $0x2c8] sm:$0xff] }
  0x2f   :  { %v243_v46 = vld [vmem:[%s3476_s1 + $0x6a0] sm:$0xff]  ;;  %483 = vmatpush.msra.mxu2 %v175_v45 }
  0x30   :  { %v43_v47 = vld [vmem:[%s3476_s1 + $0x60] sm:$0xff]  ;;  %502 = vmatpush.msra.mxu3 %v243_v46 }
  0x31   :  { %v107_v48 = vld [vmem:[%s3476_s1 + $0x260] sm:$0xff]  ;;  %444 = vmatpush.msra.mxu0 %v43_v47  ;;  %v48_v47 = vld [vmem:[%s3476_s1 + $0x88] sm:$0xff] }
  0x32   :  { %v171_v49 = vld [vmem:[%s3476_s1 + $0x460] sm:$0xff]  ;;  %464 = vmatpush.msra.mxu1 %v107_v48  ;;  %v116_v48 = vld [vmem:[%s3476_s1 + $0x2a8] sm:$0xff] }
  0x33   :  { %v239_v50 = vld [vmem:[%s3476_s1 + $0x680] sm:$0xff]  ;;  %484 = vmatpush.msra.mxu2 %v171_v49 }
  0x34   :  { %v39_v51 = vld [vmem:[%s3476_s1 + $0x40] sm:$0xff]  ;;  %503 = vmatpush.msra.mxu3 %v239_v50 }
  0x35   :  { %v103_v52 = vld [vmem:[%s3476_s1 + $0x240] sm:$0xff]  ;;  %445 = vmatpush.msra.mxu0 %v39_v51  ;;  %v44_v51 = vld [vmem:[%s3476_s1 + $0x68] sm:$0xff] }
  0x36   :  { %v167_v53 = vld [vmem:[%s3476_s1 + $0x440] sm:$0xff]  ;;  %465 = vmatpush.msra.mxu1 %v103_v52  ;;  %v112_v52 = vld [vmem:[%s3476_s1 + $0x288] sm:$0xff] }
  0x37   :  { %v235_v54 = vld [vmem:[%s3476_s1 + $0x660] sm:$0xff]  ;;  %485 = vmatpush.msra.mxu2 %v167_v53 }
  0x38   :  { %v35_v55 = vld [vmem:[%s3476_s1 + $0x20] sm:$0xff]  ;;  %504 = vmatpush.msra.mxu3 %v235_v54 }
  0x39   :  { %v99_v56 = vld [vmem:[%s3476_s1 + $0x220] sm:$0xff]  ;;  %446 = vmatpush.msra.mxu0 %v35_v55  ;;  %v40_v55 = vld [vmem:[%s3476_s1 + $0x48] sm:$0xff] }
  0x3a   :  { %v163_v57 = vld [vmem:[%s3476_s1 + $0x420] sm:$0xff]  ;;  %466 = vmatpush.msra.mxu1 %v99_v56  ;;  %v108_v56 = vld [vmem:[%s3476_s1 + $0x268] sm:$0xff] }
  0x3b   :  { %v231_v58 = vld [vmem:[%s3476_s1 + $0x640] sm:$0xff]  ;;  %486 = vmatpush.msra.mxu2 %v163_v57 }
  0x3c   :  { %v31_v59 = vld [vmem:[%s3476_s1] sm:$0xff]  ;;  %505 = vmatpush.msra.mxu3 %v231_v58 }
  0x3d   :  { %v95_v60 = vld [vmem:[%s3476_s1 + $0x200] sm:$0xff]  ;;  %447 = vmatpush.msra.mxu0 %v31_v59 }
  0x3e   :  { %v159_v61 = vld [vmem:[%s3476_s1 + $0x400] sm:$0xff]  ;;  %467 = vmatpush.msra.mxu1 %v95_v60  ;;  %v36_v60 = vld [vmem:[%s3476_s1 + $0x28] sm:$0xff] }
  0x3f   :  { %v227_v62 = vld [vmem:[%s3476_s1 + $0x620] sm:$0xff]  ;;  %487 = vmatpush.msra.mxu2 %v159_v61  ;;  %v104_v61 = vld [vmem:[%s3476_s1 + $0x248] sm:$0xff] }
  0x40   :  { %v347_v63 = vld [vmem:[%s3476_s1 + $0x9e0] sm:$0xff]  ;;  %506 = vmatpush.msra.mxu3 %v227_v62 }
  0x41   :  { %v411_v0 = vld [vmem:[%s3476_s1 + $0xbe0] sm:$0xff]  ;;  %512 = vmatpush.msrb.mxu0 %v347_v63  ;;  %552 = vmatpush.msrb.mxu2 %v92_v1 }
  0x42   :  { %v223_v2 = vld [vmem:[%s3476_s1 + $0x600] sm:$0xff]  ;;  %532 = vmatpush.msrb.mxu1 %v411_v0 }
  0x43   :  { %v343_v3 = vld [vmem:[%s3476_s1 + $0x9c0] sm:$0xff]  ;;  %507 = vmatpush.msra.mxu3 %v223_v2  ;;  %553 = vmatpush.msrb.mxu2 %v88_v5  ;;  %v32_v2 = vld [vmem:[%s3476_s1 + $0x8] sm:$0xff] }
  0x44   :  { %v407_v4 = vld [vmem:[%s3476_s1 + $0xbc0] sm:$0xff]  ;;  %513 = vmatpush.msrb.mxu0 %v343_v3  ;;  %v100_v3 = vld [vmem:[%s3476_s1 + $0x228] sm:$0xff] }
  0x45   :  { %v339_v7 = vld [vmem:[%s3476_s1 + $0x9a0] sm:$0xff]  ;;  %533 = vmatpush.msrb.mxu1 %v407_v4  ;;  %572 = vmatpush.msrb.mxu3 %v156_v6  ;;  %v220_v5 = vld [vmem:[%s3476_s1 + $0x5e8] sm:$0xff] }
  0x46   :  { %v403_v8 = vld [vmem:[%s3476_s1 + $0xba0] sm:$0xff]  ;;  %514 = vmatpush.msrb.mxu0 %v339_v7  ;;  %554 = vmatpush.msrb.mxu2 %v84_v9  ;;  %v284_v6 = vld [vmem:[%s3476_s1 + $0x7e8] sm:$0xff] }
  0x47   :  { %v335_v11 = vld [vmem:[%s3476_s1 + $0x980] sm:$0xff]  ;;  %534 = vmatpush.msrb.mxu1 %v403_v8  ;;  %573 = vmatpush.msrb.mxu3 %v152_v10  ;;  %v348_v7 = vld [vmem:[%s3476_s1 + $0x9e8] sm:$0xff] }
  0x48   :  { %v399_v12 = vld [vmem:[%s3476_s1 + $0xb80] sm:$0xff]  ;;  %515 = vmatpush.msrb.mxu0 %v335_v11  ;;  %555 = vmatpush.msrb.mxu2 %v80_v13  ;;  %v96_v8 = vld [vmem:[%s3476_s1 + $0x208] sm:$0xff] }
  0x49   :  { %v331_v15 = vld [vmem:[%s3476_s1 + $0x960] sm:$0xff]  ;;  %535 = vmatpush.msrb.mxu1 %v399_v12  ;;  %574 = vmatpush.msrb.mxu3 %v148_v14  ;;  %v216_v9 = vld [vmem:[%s3476_s1 + $0x5c8] sm:$0xff] }
  0x4a   :  { %v395_v16 = vld [vmem:[%s3476_s1 + $0xb60] sm:$0xff]  ;;  %516 = vmatpush.msrb.mxu0 %v331_v15  ;;  %556 = vmatpush.msrb.mxu2 %v76_v17  ;;  %v280_v10 = vld [vmem:[%s3476_s1 + $0x7c8] sm:$0xff] }
  0x4b   :  { %v29_v19 = vld [vmem:[%s3477_s0] sm:$0xff]  ;;  %536 = vmatpush.msrb.mxu1 %v395_v16  ;;  %575 = vmatpush.msrb.mxu3 %v144_v18  ;;  %v344_v11 = vld [vmem:[%s3476_s1 + $0x9c8] sm:$0xff] }
  0x4c   :  { %v327_v20 = vld [vmem:[%s3476_s1 + $0x940] sm:$0xff]  ;;  %417 = vst [vmem:[#allocation1] ss:$4 sm:$0xff] %v29_v19  ;;  %557 = vmatpush.msrb.mxu2 %v72_v22  ;;  %v412_v12 = vld [vmem:[%s3476_s1 + $0xbe8] sm:$0xff] }
  0x4d   :  { %v391_v21 = vld [vmem:[%s3476_s1 + $0xb40] sm:$0xff]  ;;  %517 = vmatpush.msrb.mxu0 %v327_v20  ;;  %576 = vmatpush.msrb.mxu3 %v140_v23  ;;  %v212_v13 = vld [vmem:[%s3476_s1 + $0x5a8] sm:$0xff] }
  0x4e   :  { %v323_v24 = vld [vmem:[%s3476_s1 + $0x920] sm:$0xff]  ;;  %537 = vmatpush.msrb.mxu1 %v391_v21  ;;  %558 = vmatpush.msrb.mxu2 %v68_v26  ;;  %v276_v14 = vld [vmem:[%s3476_s1 + $0x7a8] sm:$0xff] }
  0x4f   :  { %v387_v25 = vld [vmem:[%s3476_s1 + $0xb20] sm:$0xff]  ;;  %518 = vmatpush.msrb.mxu0 %v323_v24  ;;  %577 = vmatpush.msrb.mxu3 %v136_v27  ;;  %v340_v15 = vld [vmem:[%s3476_s1 + $0x9a8] sm:$0xff] }
  0x50   :  { %v319_v28 = vld [vmem:[%s3476_s1 + $0x900] sm:$0xff]  ;;  %538 = vmatpush.msrb.mxu1 %v387_v25  ;;  %559 = vmatpush.msrb.mxu2 %v64_v30  ;;  %v408_v16 = vld [vmem:[%s3476_s1 + $0xbc8] sm:$0xff] }
  0x51   :  { %v383_v29 = vld [vmem:[%s3476_s1 + $0xb00] sm:$0xff]  ;;  %519 = vmatpush.msrb.mxu0 %v319_v28  ;;  %578 = vmatpush.msrb.mxu3 %v132_v31  ;;  %v272_v18 = vld [vmem:[%s3476_s1 + $0x788] sm:$0xff] }
  0x52   :  { %v315_v32 = vld [vmem:[%s3476_s1 + $0x8e0] sm:$0xff]  ;;  %539 = vmatpush.msrb.mxu1 %v383_v29  ;;  %560 = vmatpush.msrb.mxu2 %v60_v35  ;;  %v208_v19 = vld [vmem:[%s3476_s1 + $0x588] sm:$0xff] }
  0x53   :  { %v379_v33 = vld [vmem:[%s3476_s1 + $0xae0] sm:$0xff]  ;;  %520 = vmatpush.msrb.mxu0 %v315_v32  ;;  %579 = vmatpush.msrb.mxu3 %v128_v36  ;;  %v2025_v57 = vld.sshfl [vmem:[#allocation1 + $0x10] sm:$0xff pattern:$0x73625140]  ;;  %v336_v20 = vld [vmem:[%s3476_s1 + $0x988] sm:$0xff] }
  0x54   :  { %v311_v37 = vld [vmem:[%s3476_s1 + $0x8c0] sm:$0xff]  ;;  %540 = vmatpush.msrb.mxu1 %v379_v33  ;;  %561 = vmatpush.msrb.mxu2 %v56_v39  ;;  %v2042_v63 = vld.sshfl [vmem:[#allocation1 + $0x18] sm:$0xff pattern:$0x73625140]  ;;  %v404_v21 = vld [vmem:[%s3476_s1 + $0xba8] sm:$0xff] }
  0x55   :  { %v375_v38 = vld [vmem:[%s3476_s1 + $0xac0] sm:$0xff]  ;;  %521 = vmatpush.msrb.mxu0 %v311_v37  ;;  %580 = vmatpush.msrb.mxu3 %v124_v40  ;;  %v2057_v4 = vld.sshfl [vmem:[#allocation1 + $0x8] sm:$0xff pattern:$0x73625140] }
  0x56   :  { %v307_v41 = vld [vmem:[%s3476_s1 + $0x8a0] sm:$0xff]  ;;  %541 = vmatpush.msrb.mxu1 %v375_v38  ;;  %562 = vmatpush.msrb.mxu2 %v52_v43  ;;  %v2111_v22 = vld.sshfl [vmem:[#allocation1 + $0x28] sm:$0xff pattern:$0x73625140] }
  0x57   :  { %v371_v42 = vld [vmem:[%s3476_s1 + $0xaa0] sm:$0xff]  ;;  %522 = vmatpush.msrb.mxu0 %v307_v41  ;;  %581 = vmatpush.msrb.mxu3 %v120_v44  ;;  %v204_v23 = vld [vmem:[%s3476_s1 + $0x568] sm:$0xff] }
  0x58   :  { %v303_v45 = vld [vmem:[%s3476_s1 + $0x880] sm:$0xff]  ;;  %542 = vmatpush.msrb.mxu1 %v371_v42  ;;  %563 = vmatpush.msrb.mxu2 %v48_v47  ;;  %v268_v24 = vld [vmem:[%s3476_s1 + $0x768] sm:$0xff] }
  0x59   :  { %v367_v46 = vld [vmem:[%s3476_s1 + $0xa80] sm:$0xff]  ;;  %523 = vmatpush.msrb.mxu0 %v303_v45  ;;  %582 = vmatpush.msrb.mxu3 %v116_v48  ;;  %v332_v25 = vld [vmem:[%s3476_s1 + $0x968] sm:$0xff] }
  0x5a   :  { %v299_v49 = vld [vmem:[%s3476_s1 + $0x860] sm:$0xff]  ;;  %543 = vmatpush.msrb.mxu1 %v367_v46  ;;  %564 = vmatpush.msrb.mxu2 %v44_v51  ;;  %v400_v26 = vld [vmem:[%s3476_s1 + $0xb88] sm:$0xff] }
  0x5b   :  { %v363_v50 = vld [vmem:[%s3476_s1 + $0xa60] sm:$0xff]  ;;  %524 = vmatpush.msrb.mxu0 %v299_v49  ;;  %583 = vmatpush.msrb.mxu3 %v112_v52  ;;  %v200_v27 = vld [vmem:[%s3476_s1 + $0x548] sm:$0xff] }
  0x5c   :  { %v295_v53 = vld [vmem:[%s3476_s1 + $0x840] sm:$0xff]  ;;  %544 = vmatpush.msrb.mxu1 %v363_v50  ;;  %565 = vmatpush.msrb.mxu2 %v40_v55  ;;  %v264_v28 = vld [vmem:[%s3476_s1 + $0x748] sm:$0xff] }
  0x5d   :  { %v359_v54 = vld [vmem:[%s3476_s1 + $0xa40] sm:$0xff]  ;;  %525 = vmatpush.msrb.mxu0 %v295_v53  ;;  %584 = vmatpush.msrb.mxu3 %v108_v56  ;;  %v328_v29 = vld [vmem:[%s3476_s1 + $0x948] sm:$0xff] }
  0x5e   :  { %v291_v58 = vld [vmem:[%s3476_s1 + $0x820] sm:$0xff]  ;;  %545 = vmatpush.msrb.mxu1 %v359_v54  ;;  %488 = vmatmul.f32.vlgmr.msra.gmra.mxu2 %v2025_v57  ;;  %v396_v30 = vld [vmem:[%s3476_s1 + $0xb68] sm:$0xff] }
  0x5f   :  { %v355_v59 = vld [vmem:[%s3476_s1 + $0xa20] sm:$0xff]  ;;  %526 = vmatpush.msrb.mxu0 %v291_v58  ;;  %566 = vmatpush.msrb.mxu2 %v36_v60  ;;  %v196_v31 = vld [vmem:[%s3476_s1 + $0x528] sm:$0xff] }
  0x60   :  { %v2039_v62 = vld.sshfl [vmem:[#allocation1] sm:$0xff pattern:$0x73625140]  ;;  %546 = vmatpush.msrb.mxu1 %v355_v59  ;;  %585 = vmatpush.msrb.mxu3 %v104_v61  ;;  %v260_v32 = vld [vmem:[%s3476_s1 + $0x728] sm:$0xff] }
  0x61   :  { %v287_v0 = vld [vmem:[%s3476_s1 + $0x800] sm:$0xff]  ;;  %448 = vmatmul.f32.vlgmr.msra.gmra.mxu0 %v2039_v62  ;;  %508 = vmatmul.f32.vlgmr.msra.gmra.mxu3 %v2042_v63  ;;  %v324_v33 = vld [vmem:[%s3476_s1 + $0x928] sm:$0xff] }
  0x62   :  { %v351_v1 = vld [vmem:[%s3476_s1 + $0xa00] sm:$0xff]  ;;  %527 = vmatpush.msrb.mxu0 %v287_v0  ;;  %567 = vmatpush.msrb.mxu2 %v32_v2  ;;  %v192_v35 = vld [vmem:[%s3476_s1 + $0x508] sm:$0xff] }
  0x63   :  { %547 = vmatpush.msrb.mxu1 %v351_v1  ;;  %586 = vmatpush.msrb.mxu3 %v100_v3  ;;  %v2097_v17 = vld.sshfl [vmem:[#allocation1 + $0x20] sm:$0xff pattern:$0x73625140]  ;;  %v256_v36 = vld [vmem:[%s3476_s1 + $0x708] sm:$0xff] }
  0x64   :  { %468 = vmatmul.f32.vlgmr.msra.gmra.mxu1 %v2057_v4  ;;  %592 = vmatpush.msra.mxu0 %v220_v5  ;;  %v320_v37 = vld [vmem:[%s3476_s1 + $0x908] sm:$0xff] }
  0x65   :  { %612 = vmatpush.msra.mxu1 %v284_v6  ;;  %632 = vmatpush.msra.mxu2 %v348_v7  ;;  %v388_v38 = vld [vmem:[%s3476_s1 + $0xb28] sm:$0xff] }
  0x66   :  { %587 = vmatpush.msrb.mxu3 %v96_v8  ;;  %593 = vmatpush.msra.mxu0 %v216_v9  ;;  %v188_v39 = vld [vmem:[%s3476_s1 + $0x4e8] sm:$0xff] }
  0x67   :  { %613 = vmatpush.msra.mxu1 %v280_v10  ;;  %633 = vmatpush.msra.mxu2 %v344_v11  ;;  %v252_v40 = vld [vmem:[%s3476_s1 + $0x6e8] sm:$0xff]  ;;  %v93_v11 = vld [vmem:[%s3476_s1 + $0x1f0] sm:$0xff] }
  0x68   :  { %652 = vmatpush.msra.mxu3 %v412_v12  ;;  %594 = vmatpush.msra.mxu0 %v212_v13  ;;  %v316_v41 = vld [vmem:[%s3476_s1 + $0x8e8] sm:$0xff]  ;;  %v157_v12 = vld [vmem:[%s3476_s1 + $0x3f0] sm:$0xff] }
  0x69   :  { %614 = vmatpush.msra.mxu1 %v276_v14  ;;  %634 = vmatpush.msra.mxu2 %v340_v15  ;;  %v384_v42 = vld [vmem:[%s3476_s1 + $0xb08] sm:$0xff]  ;;  %v221_v13 = vld [vmem:[%s3476_s1 + $0x5f0] sm:$0xff] }
  0x6a   :  { %653 = vmatpush.msra.mxu3 %v408_v16  ;;  %528 = vmatmul.f32.vlgmr.msrb.gmra.mxu0 %v2097_v17  ;;  %v184_v43 = vld [vmem:[%s3476_s1 + $0x4c8] sm:$0xff]  ;;  %v89_v15 = vld [vmem:[%s3476_s1 + $0x1d0] sm:$0xff] }
  0x6b   :  { %615 = vmatpush.msra.mxu1 %v272_v18  ;;  %595 = vmatpush.msra.mxu0 %v208_v19  ;;  %v248_v44 = vld [vmem:[%s3476_s1 + $0x6c8] sm:$0xff]  ;;  %v153_v16 = vld [vmem:[%s3476_s1 + $0x3d0] sm:$0xff] }
  0x6c   :  { %635 = vmatpush.msra.mxu2 %v336_v20  ;;  %654 = vmatpush.msra.mxu3 %v404_v21  ;;  %v312_v45 = vld [vmem:[%s3476_s1 + $0x8c8] sm:$0xff]  ;;  %v217_v18 = vld [vmem:[%s3476_s1 + $0x5d0] sm:$0xff] }
  0x6d   :  { %548 = vmatmul.f32.vlgmr.msrb.gmra.mxu1 %v2111_v22  ;;  %596 = vmatpush.msra.mxu0 %v204_v23  ;;  %v380_v46 = vld [vmem:[%s3476_s1 + $0xae8] sm:$0xff]  ;;  %v285_v19 = vld [vmem:[%s3476_s1 + $0x7f0] sm:$0xff] }
  0x6e   :  { %616 = vmatpush.msra.mxu1 %v268_v24  ;;  %636 = vmatpush.msra.mxu2 %v332_v25  ;;  %v180_v47 = vld [vmem:[%s3476_s1 + $0x4a8] sm:$0xff]  ;;  %v85_v20 = vld [vmem:[%s3476_s1 + $0x1b0] sm:$0xff] }
  0x6f   :  { %655 = vmatpush.msra.mxu3 %v400_v26  ;;  %597 = vmatpush.msra.mxu0 %v200_v27  ;;  %v244_v48 = vld [vmem:[%s3476_s1 + $0x6a8] sm:$0xff]  ;;  %v149_v21 = vld [vmem:[%s3476_s1 + $0x3b0] sm:$0xff] }
  0x70   :  { %617 = vmatpush.msra.mxu1 %v264_v28  ;;  %637 = vmatpush.msra.mxu2 %v328_v29  ;;  %v308_v49 = vld [vmem:[%s3476_s1 + $0x8a8] sm:$0xff]  ;;  %v213_v23 = vld [vmem:[%s3476_s1 + $0x5b0] sm:$0xff] }
  0x71   :  { %656 = vmatpush.msra.mxu3 %v396_v30  ;;  %598 = vmatpush.msra.mxu0 %v196_v31  ;;  %v376_v50 = vld [vmem:[%s3476_s1 + $0xac8] sm:$0xff]  ;;  %v281_v24 = vld [vmem:[%s3476_s1 + $0x7d0] sm:$0xff] }
  0x72   :  { %618 = vmatpush.msra.mxu1 %v260_v32  ;;  %638 = vmatpush.msra.mxu2 %v324_v33  ;;  %v176_v51 = vld [vmem:[%s3476_s1 + $0x488] sm:$0xff]  ;;  %v81_v25 = vld [vmem:[%s3476_s1 + $0x190] sm:$0xff] }
  0x73   :  { %657 = vmatpush.msra.mxu3 %v392_v34  ;;  %599 = vmatpush.msra.mxu0 %v192_v35  ;;  %v240_v52 = vld [vmem:[%s3476_s1 + $0x688] sm:$0xff]  ;;  %v145_v26 = vld [vmem:[%s3476_s1 + $0x390] sm:$0xff] }
  0x74   :  { %619 = vmatpush.msra.mxu1 %v256_v36  ;;  %639 = vmatpush.msra.mxu2 %v320_v37  ;;  %v304_v53 = vld [vmem:[%s3476_s1 + $0x888] sm:$0xff]  ;;  %v209_v27 = vld [vmem:[%s3476_s1 + $0x590] sm:$0xff] }
  0x75   :  { %658 = vmatpush.msra.mxu3 %v388_v38  ;;  %600 = vmatpush.msra.mxu0 %v188_v39  ;;  %v372_v54 = vld [vmem:[%s3476_s1 + $0xaa8] sm:$0xff]  ;;  %v277_v28 = vld [vmem:[%s3476_s1 + $0x7b0] sm:$0xff] }
  0x76   :  { %620 = vmatpush.msra.mxu1 %v252_v40  ;;  %640 = vmatpush.msra.mxu2 %v316_v41  ;;  %v172_v55 = vld [vmem:[%s3476_s1 + $0x468] sm:$0xff]  ;;  %v77_v29 = vld [vmem:[%s3476_s1 + $0x170] sm:$0xff] }
  0x77   :  { %659 = vmatpush.msra.mxu3 %v384_v42  ;;  %601 = vmatpush.msra.mxu0 %v184_v43  ;;  %v236_v56 = vld [vmem:[%s3476_s1 + $0x668] sm:$0xff]  ;;  %v141_v30 = vld [vmem:[%s3476_s1 + $0x370] sm:$0xff] }
  0x78   :  { %621 = vmatpush.msra.mxu1 %v248_v44  ;;  %641 = vmatpush.msra.mxu2 %v312_v45  ;;  %v300_v58 = vld [vmem:[%s3476_s1 + $0x868] sm:$0xff]  ;;  %v205_v31 = vld [vmem:[%s3476_s1 + $0x570] sm:$0xff] }
  0x79   :  { %660 = vmatpush.msra.mxu3 %v380_v46  ;;  %602 = vmatpush.msra.mxu0 %v180_v47  ;;  %v368_v59 = vld [vmem:[%s3476_s1 + $0xa88] sm:$0xff]  ;;  %v273_v32 = vld [vmem:[%s3476_s1 + $0x790] sm:$0xff] }
  0x7a   :  { %622 = vmatpush.msra.mxu1 %v244_v48  ;;  %642 = vmatpush.msra.mxu2 %v308_v49  ;;  %v168_v60 = vld [vmem:[%s3476_s1 + $0x448] sm:$0xff]  ;;  %v73_v33 = vld [vmem:[%s3476_s1 + $0x150] sm:$0xff] }
  0x7b   :  { %661 = vmatpush.msra.mxu3 %v376_v50  ;;  %603 = vmatpush.msra.mxu0 %v176_v51  ;;  %v232_v61 = vld [vmem:[%s3476_s1 + $0x648] sm:$0xff]  ;;  %v137_v34 = vld [vmem:[%s3476_s1 + $0x350] sm:$0xff] }
  0x7c   :  { %623 = vmatpush.msra.mxu1 %v240_v52  ;;  %643 = vmatpush.msra.mxu2 %v304_v53  ;;  %v296_v0 = vld [vmem:[%s3476_s1 + $0x848] sm:$0xff]  ;;  %v201_v35 = vld [vmem:[%s3476_s1 + $0x550] sm:$0xff] }
  0x7d   :  { %662 = vmatpush.msra.mxu3 %v372_v54  ;;  %568 = vmatmul.f32.vlgmr.msrb.gmra.mxu2 %v2039_v62  ;;  %v364_v1 = vld [vmem:[%s3476_s1 + $0xa68] sm:$0xff]  ;;  %v269_v36 = vld [vmem:[%s3476_s1 + $0x770] sm:$0xff] }
  0x7e   :  { %604 = vmatpush.msra.mxu0 %v172_v55  ;;  %624 = vmatpush.msra.mxu1 %v236_v56  ;;  %v164_v2 = vld [vmem:[%s3476_s1 + $0x428] sm:$0xff]  ;;  %v69_v37 = vld [vmem:[%s3476_s1 + $0x130] sm:$0xff] }
  0x7f   :  { %644 = vmatpush.msra.mxu2 %v300_v58  ;;  %663 = vmatpush.msra.mxu3 %v368_v59  ;;  %v228_v3 = vld [vmem:[%s3476_s1 + $0x628] sm:$0xff]  ;;  %v133_v38 = vld [vmem:[%s3476_s1 + $0x330] sm:$0xff] }
  0x80   :  { %605 = vmatpush.msra.mxu0 %v168_v60  ;;  %588 = vmatmul.f32.vlgmr.msrb.gmra.mxu3 %v2057_v4  ;;  %v292_v5 = vld [vmem:[%s3476_s1 + $0x828] sm:$0xff]  ;;  %v197_v39 = vld [vmem:[%s3476_s1 + $0x530] sm:$0xff] }
  0x81   :  { %625 = vmatpush.msra.mxu1 %v232_v61  ;;  %v360_v6 = vld [vmem:[%s3476_s1 + $0xa48] sm:$0xff]  ;;  %645 = vmatpush.msra.mxu2 %v296_v0  ;;  %v265_v40 = vld [vmem:[%s3476_s1 + $0x750] sm:$0xff] }
  0x82   :  { %664 = vmatpush.msra.mxu3 %v364_v1  ;;  %v160_v7 = vld [vmem:[%s3476_s1 + $0x408] sm:$0xff]  ;;  %606 = vmatpush.msra.mxu0 %v164_v2  ;;  %v65_v41 = vld [vmem:[%s3476_s1 + $0x110] sm:$0xff] }
  0x83   :  { %v224_v8 = vld [vmem:[%s3476_s1 + $0x608] sm:$0xff]  ;;  %626 = vmatpush.msra.mxu1 %v228_v3  ;;  %646 = vmatpush.msra.mxu2 %v292_v5  ;;  %v129_v42 = vld [vmem:[%s3476_s1 + $0x310] sm:$0xff] }
  0x84   :  { %v288_v9 = vld [vmem:[%s3476_s1 + $0x808] sm:$0xff]  ;;  %665 = vmatpush.msra.mxu3 %v360_v6  ;;  %607 = vmatpush.msra.mxu0 %v160_v7  ;;  %v193_v43 = vld [vmem:[%s3476_s1 + $0x510] sm:$0xff] }
  0x85   :  { %v356_v10 = vld [vmem:[%s3476_s1 + $0xa28] sm:$0xff]  ;;  %627 = vmatpush.msra.mxu1 %v224_v8  ;;  %647 = vmatpush.msra.mxu2 %v288_v9  ;;  %v261_v44 = vld [vmem:[%s3476_s1 + $0x730] sm:$0xff] }
  0x86   :  { %666 = vmatpush.msra.mxu3 %v356_v10  ;;  %v352_v14 = vld [vmem:[%s3476_s1 + $0xa08] sm:$0xff]  ;;  %648 = vmatmul.f32.vlgmr.msra.gmra.mxu2 %v2097_v17  ;;  %v61_v45 = vld [vmem:[%s3476_s1 + $0xf0] sm:$0xff] }
  0x87   :  { %672 = vmatpush.msrb.mxu0 %v93_v11  ;;  %692 = vmatpush.msrb.mxu1 %v157_v12  ;;  %v125_v46 = vld [vmem:[%s3476_s1 + $0x2f0] sm:$0xff] }
  0x88   :  { %712 = vmatpush.msrb.mxu2 %v221_v13  ;;  %667 = vmatpush.msra.mxu3 %v352_v14  ;;  %v189_v47 = vld [vmem:[%s3476_s1 + $0x4f0] sm:$0xff] }
  0x89   :  { %608 = vmatmul.f32.vlgmr.msra.gmra.mxu0 %v2025_v57  ;;  %668 = vmatmul.f32.vlgmr.msra.gmra.mxu3 %v2111_v22  ;;  %v257_v48 = vld [vmem:[%s3476_s1 + $0x710] sm:$0xff] }
  0x8a   :  { %673 = vmatpush.msrb.mxu0 %v89_v15  ;;  %693 = vmatpush.msrb.mxu1 %v153_v16  ;;  %v57_v49 = vld [vmem:[%s3476_s1 + $0xd0] sm:$0xff] }
  0x8b   :  { %713 = vmatpush.msrb.mxu2 %v217_v18  ;;  %732 = vmatpush.msrb.mxu3 %v285_v19  ;;  %v121_v50 = vld [vmem:[%s3476_s1 + $0x2d0] sm:$0xff] }
  0x8c   :  { %628 = vmatmul.f32.vlgmr.msra.gmra.mxu1 %v2042_v63  ;;  %674 = vmatpush.msrb.mxu0 %v85_v20  ;;  %v185_v51 = vld [vmem:[%s3476_s1 + $0x4d0] sm:$0xff]  ;;  %v94_v20 = vld [vmem:[%s3476_s1 + $0x1f8] sm:$0xff] }
  0x8d   :  { %694 = vmatpush.msrb.mxu1 %v149_v21  ;;  %714 = vmatpush.msrb.mxu2 %v213_v23  ;;  %v253_v52 = vld [vmem:[%s3476_s1 + $0x6f0] sm:$0xff] }
  0x8e   :  { %733 = vmatpush.msrb.mxu3 %v281_v24  ;;  %675 = vmatpush.msrb.mxu0 %v81_v25  ;;  %v53_v53 = vld [vmem:[%s3476_s1 + $0xb0] sm:$0xff]  ;;  %v90_v25 = vld [vmem:[%s3476_s1 + $0x1d8] sm:$0xff] }
  0x8f   :  { %695 = vmatpush.msrb.mxu1 %v145_v26  ;;  %715 = vmatpush.msrb.mxu2 %v209_v27  ;;  %v117_v54 = vld [vmem:[%s3476_s1 + $0x2b0] sm:$0xff]  ;;  %v158_v26 = vld [vmem:[%s3476_s1 + $0x3f8] sm:$0xff] }
  0x90   :  { %734 = vmatpush.msrb.mxu3 %v277_v28  ;;  %676 = vmatpush.msrb.mxu0 %v77_v29  ;;  %v181_v55 = vld [vmem:[%s3476_s1 + $0x4b0] sm:$0xff]  ;;  %v86_v29 = vld [vmem:[%s3476_s1 + $0x1b8] sm:$0xff] }
  0x91   :  { %696 = vmatpush.msrb.mxu1 %v141_v30  ;;  %716 = vmatpush.msrb.mxu2 %v205_v31  ;;  %v249_v56 = vld [vmem:[%s3476_s1 + $0x6d0] sm:$0xff]  ;;  %v154_v30 = vld [vmem:[%s3476_s1 + $0x3d8] sm:$0xff] }
  0x92   :  { %735 = vmatpush.msrb.mxu3 %v273_v32  ;;  %677 = vmatpush.msrb.mxu0 %v73_v33  ;;  %v49_v58 = vld [vmem:[%s3476_s1 + $0x90] sm:$0xff]  ;;  %v82_v33 = vld [vmem:[%s3476_s1 + $0x198] sm:$0xff] }
  0x93   :  { %697 = vmatpush.msrb.mxu1 %v137_v34  ;;  %717 = vmatpush.msrb.mxu2 %v201_v35  ;;  %v113_v59 = vld [vmem:[%s3476_s1 + $0x290] sm:$0xff]  ;;  %v150_v34 = vld [vmem:[%s3476_s1 + $0x3b8] sm:$0xff] }
  0x94   :  { %736 = vmatpush.msrb.mxu3 %v269_v36  ;;  %678 = vmatpush.msrb.mxu0 %v69_v37  ;;  %v177_v60 = vld [vmem:[%s3476_s1 + $0x490] sm:$0xff]  ;;  %v78_v37 = vld [vmem:[%s3476_s1 + $0x178] sm:$0xff] }
  0x95   :  { %698 = vmatpush.msrb.mxu1 %v133_v38  ;;  %718 = vmatpush.msrb.mxu2 %v197_v39  ;;  %v245_v61 = vld [vmem:[%s3476_s1 + $0x6b0] sm:$0xff]  ;;  %v146_v38 = vld [vmem:[%s3476_s1 + $0x398] sm:$0xff] }
  0x96   :  { %737 = vmatpush.msrb.mxu3 %v265_v40  ;;  %679 = vmatpush.msrb.mxu0 %v65_v41  ;;  %v45_v0 = vld [vmem:[%s3476_s1 + $0x70] sm:$0xff]  ;;  %v74_v41 = vld [vmem:[%s3476_s1 + $0x158] sm:$0xff] }
  0x97   :  { %699 = vmatpush.msrb.mxu1 %v129_v42  ;;  %719 = vmatpush.msrb.mxu2 %v193_v43  ;;  %v109_v1 = vld [vmem:[%s3476_s1 + $0x270] sm:$0xff]  ;;  %v142_v42 = vld [vmem:[%s3476_s1 + $0x378] sm:$0xff] }
  0x98   :  { %738 = vmatpush.msrb.mxu3 %v261_v44  ;;  %680 = vmatpush.msrb.mxu0 %v61_v45  ;;  %v173_v2 = vld [vmem:[%s3476_s1 + $0x470] sm:$0xff]  ;;  %v70_v45 = vld [vmem:[%s3476_s1 + $0x138] sm:$0xff] }
  0x99   :  { %700 = vmatpush.msrb.mxu1 %v125_v46  ;;  %720 = vmatpush.msrb.mxu2 %v189_v47  ;;  %v241_v3 = vld [vmem:[%s3476_s1 + $0x690] sm:$0xff]  ;;  %v138_v46 = vld [vmem:[%s3476_s1 + $0x358] sm:$0xff] }
  0x9a   :  { %739 = vmatpush.msrb.mxu3 %v257_v48  ;;  %681 = vmatpush.msrb.mxu0 %v57_v49  ;;  %v41_v5 = vld [vmem:[%s3476_s1 + $0x50] sm:$0xff]  ;;  %v66_v49 = vld [vmem:[%s3476_s1 + $0x118] sm:$0xff] }
  0x9b   :  { %701 = vmatpush.msrb.mxu1 %v121_v50  ;;  %721 = vmatpush.msrb.mxu2 %v185_v51  ;;  %v105_v6 = vld [vmem:[%s3476_s1 + $0x250] sm:$0xff]  ;;  %v134_v50 = vld [vmem:[%s3476_s1 + $0x338] sm:$0xff] }
  0x9c   :  { %740 = vmatpush.msrb.mxu3 %v253_v52  ;;  %682 = vmatpush.msrb.mxu0 %v53_v53  ;;  %v169_v7 = vld [vmem:[%s3476_s1 + $0x450] sm:$0xff]  ;;  %v62_v53 = vld [vmem:[%s3476_s1 + $0xf8] sm:$0xff] }
  0x9d   :  { %702 = vmatpush.msrb.mxu1 %v117_v54  ;;  %722 = vmatpush.msrb.mxu2 %v181_v55  ;;  %v237_v8 = vld [vmem:[%s3476_s1 + $0x670] sm:$0xff]  ;;  %v130_v54 = vld [vmem:[%s3476_s1 + $0x318] sm:$0xff] }
  0x9e   :  { %741 = vmatpush.msrb.mxu3 %v249_v56  ;;  %683 = vmatpush.msrb.mxu0 %v49_v58  ;;  %v37_v9 = vld [vmem:[%s3476_s1 + $0x30] sm:$0xff]  ;;  %v58_v58 = vld [vmem:[%s3476_s1 + $0xd8] sm:$0xff] }
  0x9f   :  { %703 = vmatpush.msrb.mxu1 %v113_v59  ;;  %723 = vmatpush.msrb.mxu2 %v177_v60  ;;  %v101_v10 = vld [vmem:[%s3476_s1 + $0x230] sm:$0xff]  ;;  %v126_v59 = vld [vmem:[%s3476_s1 + $0x2f8] sm:$0xff] }
  0xa0   :  { %742 = vmatpush.msrb.mxu3 %v245_v61  ;;  %684 = vmatpush.msrb.mxu0 %v45_v0  ;;  %v165_v11 = vld [vmem:[%s3476_s1 + $0x430] sm:$0xff]  ;;  %v54_v0 = vld [vmem:[%s3476_s1 + $0xb8] sm:$0xff] }
  0xa1   :  { %704 = vmatpush.msrb.mxu1 %v109_v1  ;;  %724 = vmatpush.msrb.mxu2 %v173_v2  ;;  %v233_v12 = vld [vmem:[%s3476_s1 + $0x650] sm:$0xff]  ;;  %v122_v1 = vld [vmem:[%s3476_s1 + $0x2d8] sm:$0xff] }
  0xa2   :  { %743 = vmatpush.msrb.mxu3 %v241_v3  ;;  %685 = vmatpush.msrb.mxu0 %v41_v5  ;;  %v33_v13 = vld [vmem:[%s3476_s1 + $0x10] sm:$0xff]  ;;  %v50_v5 = vld [vmem:[%s3476_s1 + $0x98] sm:$0xff] }
  0xa3   :  { %705 = vmatpush.msrb.mxu1 %v105_v6  ;;  %725 = vmatpush.msrb.mxu2 %v169_v7  ;;  %v97_v14 = vld [vmem:[%s3476_s1 + $0x210] sm:$0xff]  ;;  %v118_v6 = vld [vmem:[%s3476_s1 + $0x2b8] sm:$0xff] }
  0xa4   :  { %744 = vmatpush.msrb.mxu3 %v237_v8  ;;  %686 = vmatpush.msrb.mxu0 %v37_v9  ;;  %v161_v15 = vld [vmem:[%s3476_s1 + $0x410] sm:$0xff]  ;;  %v46_v9 = vld [vmem:[%s3476_s1 + $0x78] sm:$0xff] }
  0xa5   :  { %706 = vmatpush.msrb.mxu1 %v101_v10  ;;  %v229_v16 = vld [vmem:[%s3476_s1 + $0x630] sm:$0xff]  ;;  %726 = vmatpush.msrb.mxu2 %v165_v11 }
  0xa6   :  { %745 = vmatpush.msrb.mxu3 %v233_v12  ;;  %v349_v18 = vld [vmem:[%s3476_s1 + $0x9f0] sm:$0xff]  ;;  %687 = vmatpush.msrb.mxu0 %v33_v13  ;;  %v110_v12 = vld [vmem:[%s3476_s1 + $0x278] sm:$0xff] }
  0xa7   :  { %v413_v19 = vld [vmem:[%s3476_s1 + $0xbf0] sm:$0xff]  ;;  %707 = vmatpush.msrb.mxu1 %v97_v14  ;;  %727 = vmatpush.msrb.mxu2 %v161_v15  ;;  %v38_v14 = vld [vmem:[%s3476_s1 + $0x38] sm:$0xff] }
  0xa8   :  { %v225_v21 = vld [vmem:[%s3476_s1 + $0x610] sm:$0xff]  ;;  %746 = vmatpush.msrb.mxu3 %v229_v16  ;;  %752 = vmatpush.msra.mxu0 %v349_v18  ;;  %v106_v15 = vld [vmem:[%s3476_s1 + $0x258] sm:$0xff] }
  0xa9   :  { %v345_v23 = vld [vmem:[%s3476_s1 + $0x9d0] sm:$0xff]  ;;  %772 = vmatpush.msra.mxu1 %v413_v19  ;;  %792 = vmatpush.msra.mxu2 %v94_v20  ;;  %v34_v19 = vld [vmem:[%s3476_s1 + $0x18] sm:$0xff] }
  0xaa   :  { %v409_v24 = vld [vmem:[%s3476_s1 + $0xbd0] sm:$0xff]  ;;  %747 = vmatpush.msrb.mxu3 %v225_v21  ;;  %753 = vmatpush.msra.mxu0 %v345_v23  ;;  %v102_v20 = vld [vmem:[%s3476_s1 + $0x238] sm:$0xff] }
  0xab   :  { %v341_v27 = vld [vmem:[%s3476_s1 + $0x9b0] sm:$0xff]  ;;  %773 = vmatpush.msra.mxu1 %v409_v24  ;;  %793 = vmatpush.msra.mxu2 %v90_v25  ;;  %v286_v21 = vld [vmem:[%s3476_s1 + $0x7f8] sm:$0xff] }
  0xac   :  { %v405_v28 = vld [vmem:[%s3476_s1 + $0xbb0] sm:$0xff]  ;;  %812 = vmatpush.msra.mxu3 %v158_v26  ;;  %754 = vmatpush.msra.mxu0 %v341_v27  ;;  %v222_v23 = vld [vmem:[%s3476_s1 + $0x5f8] sm:$0xff] }
  0xad   :  { %v337_v31 = vld [vmem:[%s3476_s1 + $0x990] sm:$0xff]  ;;  %774 = vmatpush.msra.mxu1 %v405_v28  ;;  %794 = vmatpush.msra.mxu2 %v86_v29  ;;  %v350_v24 = vld [vmem:[%s3476_s1 + $0x9f8] sm:$0xff] }
  0xae   :  { %v401_v32 = vld [vmem:[%s3476_s1 + $0xb90] sm:$0xff]  ;;  %813 = vmatpush.msra.mxu3 %v154_v30  ;;  %755 = vmatpush.msra.mxu0 %v337_v31  ;;  %v98_v25 = vld [vmem:[%s3476_s1 + $0x218] sm:$0xff] }
  0xaf   :  { %v333_v35 = vld [vmem:[%s3476_s1 + $0x970] sm:$0xff]  ;;  %775 = vmatpush.msra.mxu1 %v401_v32  ;;  %795 = vmatpush.msra.mxu2 %v82_v33  ;;  %v218_v26 = vld [vmem:[%s3476_s1 + $0x5d8] sm:$0xff] }
  0xb0   :  { %v397_v36 = vld [vmem:[%s3476_s1 + $0xb70] sm:$0xff]  ;;  %814 = vmatpush.msra.mxu3 %v150_v34  ;;  %756 = vmatpush.msra.mxu0 %v333_v35  ;;  %v282_v27 = vld [vmem:[%s3476_s1 + $0x7d8] sm:$0xff] }
  0xb1   :  { %v329_v39 = vld [vmem:[%s3476_s1 + $0x950] sm:$0xff]  ;;  %776 = vmatpush.msra.mxu1 %v397_v36  ;;  %796 = vmatpush.msra.mxu2 %v78_v37  ;;  %v346_v28 = vld [vmem:[%s3476_s1 + $0x9d8] sm:$0xff] }
  0xb2   :  { %v393_v40 = vld [vmem:[%s3476_s1 + $0xb50] sm:$0xff]  ;;  %815 = vmatpush.msra.mxu3 %v146_v38  ;;  %757 = vmatpush.msra.mxu0 %v329_v39  ;;  %v414_v29 = vld [vmem:[%s3476_s1 + $0xbf8] sm:$0xff] }
  0xb3   :  { %v325_v43 = vld [vmem:[%s3476_s1 + $0x930] sm:$0xff]  ;;  %777 = vmatpush.msra.mxu1 %v393_v40  ;;  %797 = vmatpush.msra.mxu2 %v74_v41  ;;  %v278_v30 = vld [vmem:[%s3476_s1 + $0x7b8] sm:$0xff] }
  0xb4   :  { %v389_v44 = vld [vmem:[%s3476_s1 + $0xb30] sm:$0xff]  ;;  %816 = vmatpush.msra.mxu3 %v142_v42  ;;  %758 = vmatpush.msra.mxu0 %v325_v43  ;;  %v342_v31 = vld [vmem:[%s3476_s1 + $0x9b8] sm:$0xff] }
  0xb5   :  { %v321_v47 = vld [vmem:[%s3476_s1 + $0x910] sm:$0xff]  ;;  %778 = vmatpush.msra.mxu1 %v389_v44  ;;  %798 = vmatpush.msra.mxu2 %v70_v45  ;;  %v410_v32 = vld [vmem:[%s3476_s1 + $0xbd8] sm:$0xff] }
  0xb6   :  { %v385_v48 = vld [vmem:[%s3476_s1 + $0xb10] sm:$0xff]  ;;  %817 = vmatpush.msra.mxu3 %v138_v46  ;;  %759 = vmatpush.msra.mxu0 %v321_v47  ;;  %v274_v33 = vld [vmem:[%s3476_s1 + $0x798] sm:$0xff] }
  0xb7   :  { %v317_v51 = vld [vmem:[%s3476_s1 + $0x8f0] sm:$0xff]  ;;  %779 = vmatpush.msra.mxu1 %v385_v48  ;;  %799 = vmatpush.msra.mxu2 %v66_v49  ;;  %v338_v34 = vld [vmem:[%s3476_s1 + $0x998] sm:$0xff] }
  0xb8   :  { %v381_v52 = vld [vmem:[%s3476_s1 + $0xaf0] sm:$0xff]  ;;  %818 = vmatpush.msra.mxu3 %v134_v50  ;;  %760 = vmatpush.msra.mxu0 %v317_v51  ;;  %v406_v35 = vld [vmem:[%s3476_s1 + $0xbb8] sm:$0xff] }
  0xb9   :  { %v313_v55 = vld [vmem:[%s3476_s1 + $0x8d0] sm:$0xff]  ;;  %780 = vmatpush.msra.mxu1 %v381_v52  ;;  %800 = vmatpush.msra.mxu2 %v62_v53  ;;  %v206_v36 = vld [vmem:[%s3476_s1 + $0x578] sm:$0xff] }
  0xba   :  { %v377_v56 = vld [vmem:[%s3476_s1 + $0xad0] sm:$0xff]  ;;  %819 = vmatpush.msra.mxu3 %v130_v54  ;;  %761 = vmatpush.msra.mxu0 %v313_v55  ;;  %v270_v37 = vld [vmem:[%s3476_s1 + $0x778] sm:$0xff] }
  0xbb   :  { %v309_v60 = vld [vmem:[%s3476_s1 + $0x8b0] sm:$0xff]  ;;  %781 = vmatpush.msra.mxu1 %v377_v56  ;;  %801 = vmatpush.msra.mxu2 %v58_v58  ;;  %v334_v38 = vld [vmem:[%s3476_s1 + $0x978] sm:$0xff] }
  0xbc   :  { %v373_v61 = vld [vmem:[%s3476_s1 + $0xab0] sm:$0xff]  ;;  %820 = vmatpush.msra.mxu3 %v126_v59  ;;  %762 = vmatpush.msra.mxu0 %v309_v60  ;;  %v402_v39 = vld [vmem:[%s3476_s1 + $0xb98] sm:$0xff] }
  0xbd   :  { %v305_v2 = vld [vmem:[%s3476_s1 + $0x890] sm:$0xff]  ;;  %782 = vmatpush.msra.mxu1 %v373_v61  ;;  %802 = vmatpush.msra.mxu2 %v54_v0  ;;  %v202_v40 = vld [vmem:[%s3476_s1 + $0x558] sm:$0xff] }
  0xbe   :  { %v369_v3 = vld [vmem:[%s3476_s1 + $0xa90] sm:$0xff]  ;;  %821 = vmatpush.msra.mxu3 %v122_v1  ;;  %728 = vmatmul.f32.vlgmr.msrb.gmra.mxu2 %v2025_v57  ;;  %v114_v57 = vld [vmem:[%s3476_s1 + $0x298] sm:$0xff] }
  0xbf   :  { %763 = vmatpush.msra.mxu0 %v305_v2  ;;  %v301_v7 = vld [vmem:[%s3476_s1 + $0x870] sm:$0xff]  ;;  %783 = vmatpush.msra.mxu1 %v369_v3  ;;  %v266_v41 = vld [vmem:[%s3476_s1 + $0x758] sm:$0xff] }
  0xc0   :  { %803 = vmatpush.msra.mxu2 %v50_v5  ;;  %v365_v8 = vld [vmem:[%s3476_s1 + $0xa70] sm:$0xff]  ;;  %822 = vmatpush.msra.mxu3 %v118_v6  ;;  %v330_v42 = vld [vmem:[%s3476_s1 + $0x958] sm:$0xff] }
  0xc1   :  { %688 = vmatmul.f32.vlgmr.msrb.gmra.mxu0 %v2039_v62  ;;  %748 = vmatmul.f32.vlgmr.msrb.gmra.mxu3 %v2042_v63  ;;  %v297_v10 = vld [vmem:[%s3476_s1 + $0x850] sm:$0xff]  ;;  %v42_v62 = vld [vmem:[%s3476_s1 + $0x58] sm:$0xff] }
  0xc2   :  { %764 = vmatpush.msra.mxu0 %v301_v7  ;;  %v361_v11 = vld [vmem:[%s3476_s1 + $0xa50] sm:$0xff]  ;;  %784 = vmatpush.msra.mxu1 %v365_v8  ;;  %v398_v43 = vld [vmem:[%s3476_s1 + $0xb78] sm:$0xff] }
  0xc3   :  { %804 = vmatpush.msra.mxu2 %v46_v9  ;;  %823 = vmatpush.msra.mxu3 %v114_v57  ;;  %v293_v63 = vld [vmem:[%s3476_s1 + $0x830] sm:$0xff]  ;;  %v198_v44 = vld [vmem:[%s3476_s1 + $0x538] sm:$0xff] }
  0xc4   :  { %708 = vmatmul.f32.vlgmr.msrb.gmra.mxu1 %v2057_v4  ;;  %v357_v13 = vld [vmem:[%s3476_s1 + $0xa30] sm:$0xff]  ;;  %765 = vmatpush.msra.mxu0 %v297_v10  ;;  %v262_v45 = vld [vmem:[%s3476_s1 + $0x738] sm:$0xff] }
  0xc5   :  { %785 = vmatpush.msra.mxu1 %v361_v11  ;;  %805 = vmatpush.msra.mxu2 %v42_v62  ;;  %v289_v16 = vld [vmem:[%s3476_s1 + $0x810] sm:$0xff]  ;;  %v326_v46 = vld [vmem:[%s3476_s1 + $0x938] sm:$0xff]  ;;  %v1612_v11 = vld.sshfl [vmem:[#allocation1] sm:$0xff pattern:$0x73625140] }
  0xc6   :  { %824 = vmatpush.msra.mxu3 %v110_v12  ;;  %v353_v18 = vld [vmem:[%s3476_s1 + $0xa10] sm:$0xff]  ;;  %766 = vmatpush.msra.mxu0 %v293_v63  ;;  %v394_v47 = vld [vmem:[%s3476_s1 + $0xb58] sm:$0xff] }
  0xc7   :  { %786 = vmatpush.msra.mxu1 %v357_v13  ;;  %806 = vmatpush.msra.mxu2 %v38_v14  ;;  %v194_v48 = vld [vmem:[%s3476_s1 + $0x518] sm:$0xff] }
  0xc8   :  { %825 = vmatpush.msra.mxu3 %v106_v15  ;;  %767 = vmatpush.msra.mxu0 %v289_v16  ;;  %v258_v49 = vld [vmem:[%s3476_s1 + $0x718] sm:$0xff] }
  0xc9   :  { %787 = vmatpush.msra.mxu1 %v353_v18  ;;  %807 = vmatpush.msra.mxu2 %v34_v19  ;;  %v322_v50 = vld [vmem:[%s3476_s1 + $0x918] sm:$0xff] }
  0xca   :  { %826 = vmatpush.msra.mxu3 %v102_v20  ;;  %768 = vmatmul.f32.vlgmr.msra.gmra.mxu0 %v2097_v17  ;;  %v214_v17 = vld [vmem:[%s3476_s1 + $0x5b8] sm:$0xff] }
  0xcb   :  { %852 = vmatpush.msrb.mxu1 %v286_v21  ;;  %832 = vmatpush.msrb.mxu0 %v222_v23  ;;  %v390_v51 = vld [vmem:[%s3476_s1 + $0xb38] sm:$0xff]  ;;  %v950_v23 = vld [vmem:[%s3478_s2 + $0xf0] sm:$0xff] }
  0xcc   :  { %872 = vmatpush.msrb.mxu2 %v350_v24  ;;  %827 = vmatpush.msra.mxu3 %v98_v25  ;;  %v190_v52 = vld [vmem:[%s3476_s1 + $0x4f8] sm:$0xff]  ;;  %v982_v24 = vld [vmem:[%s3478_s2 + $0x1f0] sm:$0xff] }
  0xcd   :  { %788 = vmatmul.f32.vlgmr.msra.gmra.mxu1 %v2111_v22  ;;  %833 = vmatpush.msrb.mxu0 %v218_v26  ;;  %v210_v22 = vld [vmem:[%s3476_s1 + $0x598] sm:$0xff]  ;;  %v1613_v26 = vld.sshfl [vmem:[#allocation1 + $0x10] sm:$0xff pattern:$0x73625140] }
  0xce   :  { %853 = vmatpush.msrb.mxu1 %v282_v27  ;;  %873 = vmatpush.msrb.mxu2 %v346_v28  ;;  %v254_v53 = vld [vmem:[%s3476_s1 + $0x6f8] sm:$0xff]  ;;  %v1614_v27 = vld.sshfl [vmem:[#allocation1 + $0x20] sm:$0xff pattern:$0x73625140] }
  0xcf   :  { %892 = vmatpush.msrb.mxu3 %v414_v29  ;;  %834 = vmatpush.msrb.mxu0 %v214_v17  ;;  %v318_v54 = vld [vmem:[%s3476_s1 + $0x8f8] sm:$0xff]  ;;  %v948_v28 = vld [vmem:[%s3478_s2 + $0xe0] sm:$0xff] }
  0xd0   :  { %854 = vmatpush.msrb.mxu1 %v278_v30  ;;  %874 = vmatpush.msrb.mxu2 %v342_v31  ;;  %v386_v55 = vld [vmem:[%s3476_s1 + $0xb18] sm:$0xff]  ;;  %v980_v29 = vld [vmem:[%s3478_s2 + $0x1e0] sm:$0xff]  ;;  %v946_v30 = vld [vmem:[%s3478_s2 + $0xd0] sm:$0xff] }
  0xd1   :  { %893 = vmatpush.msrb.mxu3 %v410_v32  ;;  %835 = vmatpush.msrb.mxu0 %v210_v22  ;;  %v186_v56 = vld [vmem:[%s3476_s1 + $0x4d8] sm:$0xff]  ;;  %v1616_v32 = vld.sshfl [vmem:[#allocation1 + $0x28] sm:$0xff pattern:$0x73625140]  ;;  %v978_v22 = vld [vmem:[%s3478_s2 + $0x1d0] sm:$0xff] }
  0xd2   :  { %855 = vmatpush.msrb.mxu1 %v274_v33  ;;  %875 = vmatpush.msrb.mxu2 %v338_v34  ;;  %v250_v58 = vld [vmem:[%s3476_s1 + $0x6d8] sm:$0xff]  ;;  %v944_v33 = vld [vmem:[%s3478_s2 + $0xc0] sm:$0xff] }
  0xd3   :  { %894 = vmatpush.msrb.mxu3 %v406_v35  ;;  %836 = vmatpush.msrb.mxu0 %v206_v36  ;;  %v314_v59 = vld [vmem:[%s3476_s1 + $0x8d8] sm:$0xff]  ;;  %v976_v35 = vld [vmem:[%s3478_s2 + $0x1c0] sm:$0xff] }
  0xd4   :  { %856 = vmatpush.msrb.mxu1 %v270_v37  ;;  %876 = vmatpush.msrb.mxu2 %v334_v38  ;;  %v382_v60 = vld [vmem:[%s3476_s1 + $0xaf8] sm:$0xff]  ;;  %v942_v37 = vld [vmem:[%s3478_s2 + $0xb0] sm:$0xff] }
  0xd5   :  { %895 = vmatpush.msrb.mxu3 %v402_v39  ;;  %837 = vmatpush.msrb.mxu0 %v202_v40  ;;  %v182_v61 = vld [vmem:[%s3476_s1 + $0x4b8] sm:$0xff]  ;;  %v974_v39 = vld [vmem:[%s3478_s2 + $0x1b0] sm:$0xff]  ;;  %v940_v40 = vld [vmem:[%s3478_s2 + $0xa0] sm:$0xff] }
  0xd6   :  { %857 = vmatpush.msrb.mxu1 %v266_v41  ;;  %877 = vmatpush.msrb.mxu2 %v330_v42  ;;  %v246_v0 = vld [vmem:[%s3476_s1 + $0x6b8] sm:$0xff]  ;;  %v972_v41 = vld [vmem:[%s3478_s2 + $0x1a0] sm:$0xff] }
  0xd7   :  { %896 = vmatpush.msrb.mxu3 %v398_v43  ;;  %838 = vmatpush.msrb.mxu0 %v198_v44  ;;  %v310_v1 = vld [vmem:[%s3476_s1 + $0x8b8] sm:$0xff]  ;;  %v938_v43 = vld [vmem:[%s3478_s2 + $0x90] sm:$0xff] }
  0xd8   :  { %858 = vmatpush.msrb.mxu1 %v262_v45  ;;  %878 = vmatpush.msrb.mxu2 %v326_v46  ;;  %v378_v2 = vld [vmem:[%s3476_s1 + $0xad8] sm:$0xff]  ;;  %v970_v45 = vld [vmem:[%s3478_s2 + $0x190] sm:$0xff]  ;;  %v936_v46 = vld [vmem:[%s3478_s2 + $0x80] sm:$0xff] }
  0xd9   :  { %897 = vmatpush.msrb.mxu3 %v394_v47  ;;  %839 = vmatpush.msrb.mxu0 %v194_v48  ;;  %v178_v3 = vld [vmem:[%s3476_s1 + $0x498] sm:$0xff]  ;;  %v968_v47 = vld [vmem:[%s3478_s2 + $0x180] sm:$0xff] }
  0xda   :  { %859 = vmatpush.msrb.mxu1 %v258_v49  ;;  %879 = vmatpush.msrb.mxu2 %v322_v50  ;;  %v242_v5 = vld [vmem:[%s3476_s1 + $0x698] sm:$0xff]  ;;  %v934_v49 = vld [vmem:[%s3478_s2 + $0x70] sm:$0xff] }
  0xdb   :  { %898 = vmatpush.msrb.mxu3 %v390_v51  ;;  %840 = vmatpush.msrb.mxu0 %v190_v52  ;;  %v306_v6 = vld [vmem:[%s3476_s1 + $0x898] sm:$0xff]  ;;  %v966_v51 = vld [vmem:[%s3478_s2 + $0x170] sm:$0xff]  ;;  %v932_v52 = vld [vmem:[%s3478_s2 + $0x60] sm:$0xff] }
  0xdc   :  { %860 = vmatpush.msrb.mxu1 %v254_v53  ;;  %880 = vmatpush.msrb.mxu2 %v318_v54  ;;  %v374_v7 = vld [vmem:[%s3476_s1 + $0xab8] sm:$0xff]  ;;  %v964_v53 = vld [vmem:[%s3478_s2 + $0x160] sm:$0xff]  ;;  %v1014_v54 = vld [vmem:[%s3478_s2 + $0x2f0] sm:$0xff] }
  0xdd   :  { %899 = vmatpush.msrb.mxu3 %v386_v55  ;;  %841 = vmatpush.msrb.mxu0 %v186_v56  ;;  %v174_v8 = vld [vmem:[%s3476_s1 + $0x478] sm:$0xff]  ;;  %v930_v56 = vld [vmem:[%s3478_s2 + $0x50] sm:$0xff] }
  0xde   :  { %861 = vmatpush.msrb.mxu1 %v250_v58  ;;  %881 = vmatpush.msrb.mxu2 %v314_v59  ;;  %v238_v9 = vld [vmem:[%s3476_s1 + $0x678] sm:$0xff]  ;;  %v449_v34 = vpop.f32.mrf.mxu0  ;;  %v962_v59 = vld [vmem:[%s3478_s2 + $0x150] sm:$0xff] }
  0xdf   :  { %900 = vmatpush.msrb.mxu3 %v382_v60  ;;  %842 = vmatpush.msrb.mxu0 %v182_v61  ;;  %v302_v57 = vld [vmem:[%s3476_s1 + $0x878] sm:$0xff]  ;;  %v1012_v60 = vld [vmem:[%s3478_s2 + $0x2e0] sm:$0xff] }
  0xe0   :  { %862 = vmatpush.msrb.mxu1 %v246_v0  ;;  %882 = vmatpush.msrb.mxu2 %v310_v1  ;;  %v370_v10 = vld [vmem:[%s3476_s1 + $0xa98] sm:$0xff]  ;;  %v928_v61 = vld [vmem:[%s3478_s2 + $0x40] sm:$0xff] }
  0xe1   :  { %901 = vmatpush.msrb.mxu3 %v378_v2  ;;  %843 = vmatpush.msrb.mxu0 %v178_v3  ;;  %v170_v62 = vld [vmem:[%s3476_s1 + $0x458] sm:$0xff]  ;;  %v469_v31 = vpop.f32.mrf.mxu1  ;;  %v489_v38 = vpop.f32.mrf.mxu2  ;;  %v960_v1 = vld [vmem:[%s3478_s2 + $0x140] sm:$0xff]  ;;  %v1010_v2 = vld [vmem:[%s3478_s2 + $0x2d0] sm:$0xff] }
  0xe2   :  { %863 = vmatpush.msrb.mxu1 %v242_v5  ;;  %883 = vmatpush.msrb.mxu2 %v306_v6  ;;  %v234_v12 = vld [vmem:[%s3476_s1 + $0x658] sm:$0xff]  ;;  %v470_v36 = vadd.f32 %v469_v31, %v449_v34  ;;  %v926_v5 = vld [vmem:[%s3478_s2 + $0x30] sm:$0xff]  ;;  %v996_v34 = vld [vmem:[%s3478_s2 + $0x260] sm:$0xff] }
  0xe3   :  { %902 = vmatpush.msrb.mxu3 %v374_v7  ;;  %808 = vmatmul.f32.vlgmr.msra.gmra.mxu2 %v1612_v11  ;;  %v298_v63 = vld [vmem:[%s3476_s1 + $0x858] sm:$0xff]  ;;  %v958_v6 = vld [vmem:[%s3478_s2 + $0x130] sm:$0xff] }
  0xe4   :  { %828 = vmatmul.f32.vlgmr.msra.gmra.mxu3 %v2057_v4  ;;  %844 = vmatpush.msrb.mxu0 %v174_v8  ;;  %v366_v13 = vld [vmem:[%s3476_s1 + $0xa78] sm:$0xff]  ;;  %v490_v42 = vadd.f32 %v489_v38, %v470_v36  ;;  %v509_v44 = vpop.f32.mrf.mxu3  ;;  %v1008_v8 = vld [vmem:[%s3478_s2 + $0x2c0] sm:$0xff]  ;;  %v998_v31 = vld [vmem:[%s3478_s2 + $0x270] sm:$0xff] }
  0xe5   :  { %864 = vmatpush.msrb.mxu1 %v238_v9  ;;  %884 = vmatpush.msrb.mxu2 %v302_v57  ;;  %v166_v4 = vld [vmem:[%s3476_s1 + $0x438] sm:$0xff]  ;;  %v924_v9 = vld [vmem:[%s3478_s2 + $0x20] sm:$0xff]  ;;  %v977_v36 = vld [vmem:[%s3478_s2 + $0x1c8] sm:$0xff] }
  0xe6   :  { %903 = vmatpush.msrb.mxu3 %v370_v10  ;;  %v230_v14 = vld [vmem:[%s3476_s1 + $0x638] sm:$0xff]  ;;  %845 = vmatpush.msrb.mxu0 %v170_v62  ;;  %v510_v48 = vadd.f32 %v509_v44, %v490_v42  ;;  %v956_v10 = vld [vmem:[%s3478_s2 + $0x120] sm:$0xff]  ;;  %v1006_v62 = vld [vmem:[%s3478_s2 + $0x2b0] sm:$0xff] }
  0xe7   :  { %865 = vmatpush.msrb.mxu1 %v234_v12  ;;  %v294_v15 = vld [vmem:[%s3476_s1 + $0x838] sm:$0xff]  ;;  %885 = vmatpush.msrb.mxu2 %v298_v63  ;;  %v529_v50 = vpop.f32.mrf.mxu0  ;;  %v922_v63 = vld [vmem:[%s3478_s2 + $0x10] sm:$0xff]  ;;  %v941_v42 = vld [vmem:[%s3478_s2 + $0xa8] sm:$0xff] }
  0xe8   :  { %v362_v16 = vld [vmem:[%s3476_s1 + $0xa58] sm:$0xff]  ;;  %904 = vmatpush.msrb.mxu3 %v366_v13  ;;  %846 = vmatpush.msrb.mxu0 %v166_v4  ;;  %v530_v55 = vadd.f32 %v529_v50, %v510_v48  ;;  %v954_v4 = vld [vmem:[%s3478_s2 + $0x110] sm:$0xff]  ;;  %v937_v48 = vld [vmem:[%s3478_s2 + $0x88] sm:$0xff] }
  0xe9   :  { %v162_v18 = vld [vmem:[%s3476_s1 + $0x418] sm:$0xff]  ;;  %866 = vmatpush.msrb.mxu1 %v230_v14  ;;  %886 = vmatpush.msrb.mxu2 %v294_v15  ;;  %v1004_v14 = vld [vmem:[%s3478_s2 + $0x2a0] sm:$0xff]  ;;  %v994_v38 = vld [vmem:[%s3478_s2 + $0x250] sm:$0xff] }
  0xea   :  { %v226_v19 = vld [vmem:[%s3476_s1 + $0x618] sm:$0xff]  ;;  %905 = vmatpush.msrb.mxu3 %v362_v16  ;;  %847 = vmatpush.msrb.mxu0 %v162_v18  ;;  %v549_v58 = vpop.f32.mrf.mxu1  ;;  %v920_v15 = vld [vmem:[%s3478_s2] sm:$0xff]  ;;  %v990_v44 = vld [vmem:[%s3478_s2 + $0x230] sm:$0xff] }
  0xeb   :  { %v290_v20 = vld [vmem:[%s3476_s1 + $0x818] sm:$0xff]  ;;  %867 = vmatpush.msrb.mxu1 %v226_v19  ;;  %848 = vmatmul.f32.vlgmr.msrb.gmra.mxu0 %v1613_v26  ;;  %v550_v3 = vadd.f32 %v549_v58, %v530_v55  ;;  %v952_v18 = vld [vmem:[%s3478_s2 + $0x100] sm:$0xff]  ;;  %v986_v50 = vld [vmem:[%s3478_s2 + $0x210] sm:$0xff] }
  0xec   :  { %v358_v21 = vld [vmem:[%s3476_s1 + $0xa38] sm:$0xff]  ;;  %887 = vmatpush.msrb.mxu2 %v290_v20  ;;  %1048 = vmatpush.msra.mxu0 %v950_v23  ;;  %v965_v55 = vld [vmem:[%s3478_s2 + $0x168] sm:$0xff]  ;;  %v1046_v58 = vld [vmem:[%s3478_s2 + $0x3f0] sm:$0xff] }
  0xed   :  { %906 = vmatpush.msrb.mxu3 %v358_v21  ;;  %v354_v25 = vld [vmem:[%s3476_s1 + $0xa18] sm:$0xff]  ;;  %888 = vmatmul.f32.vlgmr.msrb.gmra.mxu2 %v1614_v27  ;;  %v912_v12 = vmul.f32 0.2, %v550_v3  ;;  %v1002_v21 = vld [vmem:[%s3478_s2 + $0x290] sm:$0xff]  ;;  %v949_v27 = vld [vmem:[%s3478_s2 + $0xe8] sm:$0xff] }
  0xee   :  { %1068 = vmatpush.msra.mxu1 %v982_v24  ;;  %v1615_v17 = vld.sshfl [vmem:[#allocation1 + $0x18] sm:$0xff pattern:$0x73625140]  ;;  %1049 = vmatpush.msra.mxu0 %v948_v28  ;;  %v981_v28 = vld [vmem:[%s3478_s2 + $0x1e8] sm:$0xff] }
  0xef   :  { %907 = vmatpush.msrb.mxu3 %v354_v25  ;;  %868 = vmatmul.f32.vlgmr.msrb.gmra.mxu1 %v1615_v17  ;;  %v2968_v23 = vmax.f32 %v550_v3, %v912_v12  ;;  %v951_v24 = vld [vmem:[%s3478_s2 + $0xf8] sm:$0xff]  ;;  %v1000_v17 = vld [vmem:[%s3478_s2 + $0x280] sm:$0xff] }
  0xf0   :  { %908 = vmatmul.f32.vlgmr.msrb.gmra.mxu3 %v1616_v32  ;;  %1069 = vmatpush.msra.mxu1 %v980_v29  ;;  %v983_v25 = vld [vmem:[%s3478_s2 + $0x1f8] sm:$0xff]  ;;  %v1044_v3 = vld [vmem:[%s3478_s2 + $0x3e0] sm:$0xff] }
  0xf1   :  { %1050 = vmatpush.msra.mxu0 %v946_v30  ;;  %1088 = vmatpush.msra.mxu2 %v1014_v54  ;;  %v947_v32 = vld [vmem:[%s3478_s2 + $0xd8] sm:$0xff]  ;;  %v933_v54 = vld [vmem:[%s3478_s2 + $0x68] sm:$0xff] }
  0xf2   :  { %1070 = vmatpush.msra.mxu1 %v978_v22  ;;  %v979_v22 = vld [vmem:[%s3478_s2 + $0x1d8] sm:$0xff]  ;;  %1108 = vmatpush.msra.mxu3 %v1046_v58 }
  0xf3   :  { %1051 = vmatpush.msra.mxu0 %v944_v33  ;;  %1089 = vmatpush.msra.mxu2 %v1012_v60  ;;  %v963_v60 = vld [vmem:[%s3478_s2 + $0x158] sm:$0xff] }
  0xf4   :  { %1071 = vmatpush.msra.mxu1 %v976_v35  ;;  %v945_v35 = vld [vmem:[%s3478_s2 + $0xc8] sm:$0xff]  ;;  %1109 = vmatpush.msra.mxu3 %v1044_v3  ;;  %v955_v12 = vld [vmem:[%s3478_s2 + $0x118] sm:$0xff] }
  0xf5   :  { %1052 = vmatpush.msra.mxu0 %v942_v37  ;;  %1090 = vmatpush.msra.mxu2 %v1010_v2  ;;  %v1011_v2 = vld [vmem:[%s3478_s2 + $0x2d8] sm:$0xff]  ;;  %v1017_v3 = vld [vmem:[%s3478_s2 + $0x308] sm:$0xff] }
  0xf6   :  { %1072 = vmatpush.msra.mxu1 %v974_v39  ;;  %v943_v39 = vld [vmem:[%s3478_s2 + $0xb8] sm:$0xff] }
  0xf7   :  { %1053 = vmatpush.msra.mxu0 %v940_v40  ;;  %1091 = vmatpush.msra.mxu2 %v1008_v8  ;;  %v975_v40 = vld [vmem:[%s3478_s2 + $0x1b8] sm:$0xff]  ;;  %v1042_v8 = vld [vmem:[%s3478_s2 + $0x3d0] sm:$0xff] }
  0xf8   :  { %1073 = vmatpush.msra.mxu1 %v972_v41  ;;  %v992_v41 = vld [vmem:[%s3478_s2 + $0x240] sm:$0xff]  ;;  %1110 = vmatpush.msra.mxu3 %v1042_v8  ;;  %v1031_v58 = vld [vmem:[%s3478_s2 + $0x378] sm:$0xff] }
  0xf9   :  { %1054 = vmatpush.msra.mxu0 %v938_v43  ;;  %1092 = vmatpush.msra.mxu2 %v1006_v62  ;;  %v973_v43 = vld [vmem:[%s3478_s2 + $0x1a8] sm:$0xff]  ;;  %v923_v62 = vld [vmem:[%s3478_s2 + $0x18] sm:$0xff] }
  0xfa   :  { %1074 = vmatpush.msra.mxu1 %v970_v45  ;;  %v939_v45 = vld [vmem:[%s3478_s2 + $0x98] sm:$0xff] }
  0xfb   :  { %1055 = vmatpush.msra.mxu0 %v936_v46  ;;  %1093 = vmatpush.msra.mxu2 %v1004_v14  ;;  %v971_v46 = vld [vmem:[%s3478_s2 + $0x198] sm:$0xff]  ;;  %v1038_v14 = vld [vmem:[%s3478_s2 + $0x3b0] sm:$0xff] }
  0xfc   :  { %1075 = vmatpush.msra.mxu1 %v968_v47  ;;  %v988_v47 = vld [vmem:[%s3478_s2 + $0x220] sm:$0xff] }
  0xfd   :  { %1056 = vmatpush.msra.mxu0 %v934_v49  ;;  %1094 = vmatpush.msra.mxu2 %v1002_v21  ;;  %v969_v49 = vld [vmem:[%s3478_s2 + $0x188] sm:$0xff]  ;;  %v1032_v21 = vld [vmem:[%s3478_s2 + $0x380] sm:$0xff] }
  0xfe   :  { %1076 = vmatpush.msra.mxu1 %v966_v51  ;;  %v935_v51 = vld [vmem:[%s3478_s2 + $0x78] sm:$0xff] }
  0xff   :  { %1057 = vmatpush.msra.mxu0 %v932_v52  ;;  %1095 = vmatpush.msra.mxu2 %v1000_v17  ;;  %v967_v52 = vld [vmem:[%s3478_s2 + $0x178] sm:$0xff]  ;;  %v1024_v17 = vld [vmem:[%s3478_s2 + $0x340] sm:$0xff] }
 0x100   :  { %1077 = vmatpush.msra.mxu1 %v964_v53  ;;  %v569_v0 = vpop.f32.mrf.mxu2  ;;  %v984_v53 = vld [vmem:[%s3478_s2 + $0x200] sm:$0xff] }
 0x101   :  { %1058 = vmatpush.msra.mxu0 %v930_v56  ;;  %1096 = vmatpush.msra.mxu2 %v998_v31  ;;  %v1015_v56 = vld [vmem:[%s3478_s2 + $0x2f8] sm:$0xff]  ;;  %v1022_v31 = vld [vmem:[%s3478_s2 + $0x330] sm:$0xff] }
 0x102   :  { %1078 = vmatpush.msra.mxu1 %v962_v59  ;;  %v931_v59 = vld [vmem:[%s3478_s2 + $0x58] sm:$0xff] }
 0x103   :  { %1059 = vmatpush.msra.mxu0 %v928_v61  ;;  %v589_v7 = vpop.f32.mrf.mxu3  ;;  %1097 = vmatpush.msra.mxu2 %v996_v34  ;;  %v1013_v61 = vld [vmem:[%s3478_s2 + $0x2e8] sm:$0xff] }
 0x104   :  { %1079 = vmatpush.msra.mxu1 %v960_v1  ;;  %v590_v57 = vadd.f32 %v589_v7, %v569_v0  ;;  %v929_v0 = vld [vmem:[%s3478_s2 + $0x48] sm:$0xff] }
 0x105   :  { %1060 = vmatpush.msra.mxu0 %v926_v5  ;;  %1098 = vmatpush.msra.mxu2 %v994_v38  ;;  %v961_v1 = vld [vmem:[%s3478_s2 + $0x148] sm:$0xff]  ;;  %v927_v5 = vld [vmem:[%s3478_s2 + $0x38] sm:$0xff] }
 0x106   :  { %v609_v11 = vpop.f32.mrf.mxu0  ;;  %1080 = vmatpush.msra.mxu1 %v958_v6  ;;  %v959_v6 = vld [vmem:[%s3478_s2 + $0x138] sm:$0xff]  ;;  %v1009_v7 = vld [vmem:[%s3478_s2 + $0x2c8] sm:$0xff] }
 0x107   :  { %v610_v13 = vadd.f32 %v609_v11, %v590_v57  ;;  %1061 = vmatpush.msra.mxu0 %v924_v9  ;;  %1099 = vmatpush.msra.mxu2 %v992_v41  ;;  %v925_v9 = vld [vmem:[%s3478_s2 + $0x28] sm:$0xff]  ;;  %v1040_v11 = vld [vmem:[%s3478_s2 + $0x3c0] sm:$0xff]  ;;  %v1047_v38 = vld [vmem:[%s3478_s2 + $0x3f8] sm:$0xff] }
 0x108   :  { %1081 = vmatpush.msra.mxu1 %v956_v10  ;;  %v957_v57 = vld [vmem:[%s3478_s2 + $0x128] sm:$0xff]  ;;  %v1007_v10 = vld [vmem:[%s3478_s2 + $0x2b8] sm:$0xff]  ;;  %1111 = vmatpush.msra.mxu3 %v1040_v11 }
 0x109   :  { %v629_v16 = vpop.f32.mrf.mxu1  ;;  %1062 = vmatpush.msra.mxu0 %v922_v63  ;;  %v649_v20 = vpop.f32.mrf.mxu2  ;;  %1100 = vmatpush.msra.mxu2 %v990_v44  ;;  %v1005_v63 = vld [vmem:[%s3478_s2 + $0x2a8] sm:$0xff]  ;;  %v1043_v44 = vld [vmem:[%s3478_s2 + $0x3d8] sm:$0xff] }
 0x10a   :  { %v630_v19 = vadd.f32 %v629_v16, %v610_v13  ;;  %1082 = vmatpush.msra.mxu1 %v954_v4  ;;  %v921_v13 = vld [vmem:[%s3478_s2 + $0x8] sm:$0xff]  ;;  %1112 = vmatpush.msra.mxu3 %v1038_v14  ;;  %v1223_v14 = vld [vmem:[%s3479_s3 + $0x78] sm:$0xff] }
 0x10b   :  { %1063 = vmatpush.msra.mxu0 %v920_v15  ;;  %1101 = vmatpush.msra.mxu2 %v988_v47  ;;  %v953_v4 = vld [vmem:[%s3478_s2 + $0x108] sm:$0xff]  ;;  %v1003_v15 = vld [vmem:[%s3478_s2 + $0x298] sm:$0xff] }
 0x10c   :  { %v650_v26 = vadd.f32 %v649_v20, %v630_v19  ;;  %1083 = vmatpush.msra.mxu1 %v952_v18  ;;  %1064 = vmatmul.f32.vlgmr.msra.gmra.mxu0 %v2968_v23  ;;  %v669_v29 = vpop.f32.mrf.mxu3  ;;  %v1001_v16 = vld [vmem:[%s3478_s2 + $0x288] sm:$0xff]  ;;  %v1036_v18 = vld [vmem:[%s3478_s2 + $0x3a0] sm:$0xff]  ;;  %v999_v19 = vld [vmem:[%s3478_s2 + $0x278] sm:$0xff] }
 0x10d   :  { %1128 = vmatpush.msrb.mxu0 %v951_v24  ;;  %1102 = vmatpush.msra.mxu2 %v986_v50  ;;  %v1034_v20 = vld [vmem:[%s3478_s2 + $0x390] sm:$0xff]  ;;  %v1045_v41 = vld [vmem:[%s3478_s2 + $0x3e8] sm:$0xff] }
 0x10e   :  { %1148 = vmatpush.msrb.mxu1 %v983_v25  ;;  %v670_v30 = vadd.f32 %v669_v29, %v650_v26  ;;  %1113 = vmatpush.msra.mxu3 %v1036_v18  ;;  %v1030_v24 = vld [vmem:[%s3478_s2 + $0x370] sm:$0xff]  ;;  %v995_v25 = vld [vmem:[%s3478_s2 + $0x258] sm:$0xff]  ;;  %v1028_v26 = vld [vmem:[%s3478_s2 + $0x360] sm:$0xff] }
 0x10f   :  { %1129 = vmatpush.msrb.mxu0 %v949_v27  ;;  %1103 = vmatpush.msra.mxu2 %v984_v53  ;;  %v993_v27 = vld [vmem:[%s3478_s2 + $0x248] sm:$0xff]  ;;  %v991_v29 = vld [vmem:[%s3478_s2 + $0x238] sm:$0xff] }
 0x110   :  { %1149 = vmatpush.msrb.mxu1 %v981_v28  ;;  %v913_v33 = vmul.f32 0.2, %v670_v30  ;;  %1114 = vmatpush.msra.mxu3 %v1034_v20  ;;  %v1026_v28 = vld [vmem:[%s3478_s2 + $0x350] sm:$0xff]  ;;  %v1041_v47 = vld [vmem:[%s3478_s2 + $0x3c8] sm:$0xff] }
 0x111   :  { %1130 = vmatpush.msrb.mxu0 %v947_v32  ;;  %1168 = vmatpush.msrb.mxu2 %v1015_v56  ;;  %v987_v32 = vld [vmem:[%s3478_s2 + $0x218] sm:$0xff]  ;;  %v1037_v53 = vld [vmem:[%s3478_s2 + $0x3a8] sm:$0xff] }
 0x112   :  { %1150 = vmatpush.msrb.mxu1 %v979_v22  ;;  %v3004_v37 = vmax.f32 %v670_v30, %v913_v33  ;;  %1115 = vmatpush.msra.mxu3 %v1032_v21  ;;  %v989_v30 = vld [vmem:[%s3478_s2 + $0x228] sm:$0xff]  ;;  %v1020_v22 = vld [vmem:[%s3478_s2 + $0x320] sm:$0xff] }
 0x113   :  { %1131 = vmatpush.msrb.mxu0 %v945_v35  ;;  %1169 = vmatpush.msrb.mxu2 %v1013_v61  ;;  %v985_v33 = vld [vmem:[%s3478_s2 + $0x208] sm:$0xff]  ;;  %v1018_v35 = vld [vmem:[%s3478_s2 + $0x310] sm:$0xff]  ;;  %v1220_v21 = vld [vmem:[%s3479_s3 + $0x60] sm:$0xff] }
 0x114   :  { %1151 = vmatpush.msrb.mxu1 %v977_v36  ;;  %1116 = vmatpush.msra.mxu3 %v1030_v24  ;;  %v1016_v36 = vld [vmem:[%s3478_s2 + $0x300] sm:$0xff]  ;;  %v1033_v56 = vld [vmem:[%s3478_s2 + $0x388] sm:$0xff]  ;;  %v1219_v24 = vld [vmem:[%s3479_s3 + $0x58] sm:$0xff] }
 0x115   :  { %1084 = vmatmul.f32.vlgmr.msra.gmra.mxu1 %v3004_v37  ;;  %1132 = vmatpush.msrb.mxu0 %v943_v39  ;;  %v1025_v61 = vld [vmem:[%s3478_s2 + $0x348] sm:$0xff] }
 0x116   :  { %1152 = vmatpush.msrb.mxu1 %v975_v40  ;;  %1170 = vmatpush.msrb.mxu2 %v1011_v2  ;;  %v1019_v2 = vld [vmem:[%s3478_s2 + $0x318] sm:$0xff]  ;;  %v1221_v18 = vld [vmem:[%s3479_s3 + $0x68] sm:$0xff] }
 0x117   :  { %1133 = vmatpush.msrb.mxu0 %v941_v42  ;;  %1117 = vmatpush.msra.mxu3 %v1028_v26  ;;  %v1237_v20 = vld [vmem:[%s3479_s3 + $0xe8] sm:$0xff] }
 0x118   :  { %1153 = vmatpush.msrb.mxu1 %v973_v43  ;;  %1171 = vmatpush.msrb.mxu2 %v1009_v7  ;;  %v1217_v26 = vld [vmem:[%s3479_s3 + $0x48] sm:$0xff] }
 0x119   :  { %1134 = vmatpush.msrb.mxu0 %v939_v45  ;;  %1118 = vmatpush.msra.mxu3 %v1026_v28  ;;  %v1215_v28 = vld [vmem:[%s3479_s3 + $0x38] sm:$0xff] }
 0x11a   :  { %1154 = vmatpush.msrb.mxu1 %v971_v46  ;;  %1172 = vmatpush.msrb.mxu2 %v1007_v10 }
 0x11b   :  { %1135 = vmatpush.msrb.mxu0 %v937_v48  ;;  %1119 = vmatpush.msra.mxu3 %v1024_v17  ;;  %v1214_v17 = vld [vmem:[%s3479_s3 + $0x30] sm:$0xff] }
 0x11c   :  { %1155 = vmatpush.msrb.mxu1 %v969_v49  ;;  %1173 = vmatpush.msrb.mxu2 %v1005_v63 }
 0x11d   :  { %1136 = vmatpush.msrb.mxu0 %v935_v51  ;;  %1120 = vmatpush.msra.mxu3 %v1022_v31  ;;  %v1039_v51 = vld [vmem:[%s3478_s2 + $0x3b8] sm:$0xff]  ;;  %v1213_v31 = vld [vmem:[%s3479_s3 + $0x28] sm:$0xff] }
 0x11e   :  { %1156 = vmatpush.msrb.mxu1 %v967_v52  ;;  %1174 = vmatpush.msrb.mxu2 %v1003_v15  ;;  %v1222_v15 = vld [vmem:[%s3479_s3 + $0x70] sm:$0xff] }
 0x11f   :  { %1137 = vmatpush.msrb.mxu0 %v933_v54  ;;  %1121 = vmatpush.msra.mxu3 %v1020_v22  ;;  %v1035_v54 = vld [vmem:[%s3478_s2 + $0x398] sm:$0xff]  ;;  %v1212_v22 = vld [vmem:[%s3479_s3 + $0x20] sm:$0xff] }
 0x120   :  { %1157 = vmatpush.msrb.mxu1 %v965_v55  ;;  %1175 = vmatpush.msrb.mxu2 %v1001_v16  ;;  %v1239_v16 = vld [vmem:[%s3479_s3 + $0xf8] sm:$0xff] }
 0x121   :  { %1138 = vmatpush.msrb.mxu0 %v931_v59  ;;  %1122 = vmatpush.msra.mxu3 %v1018_v35  ;;  %v1029_v59 = vld [vmem:[%s3478_s2 + $0x368] sm:$0xff]  ;;  %v1231_v35 = vld [vmem:[%s3479_s3 + $0xb8] sm:$0xff] }
 0x122   :  { %1158 = vmatpush.msrb.mxu1 %v963_v60  ;;  %1176 = vmatpush.msrb.mxu2 %v999_v19  ;;  %v1027_v60 = vld [vmem:[%s3478_s2 + $0x358] sm:$0xff]  ;;  %v1238_v19 = vld [vmem:[%s3479_s3 + $0xf0] sm:$0xff] }
 0x123   :  { %1139 = vmatpush.msrb.mxu0 %v929_v0  ;;  %1123 = vmatpush.msra.mxu3 %v1016_v36  ;;  %v1023_v0 = vld [vmem:[%s3478_s2 + $0x338] sm:$0xff]  ;;  %v1210_v36 = vld [vmem:[%s3479_s3 + $0x10] sm:$0xff] }
 0x124   :  { %1159 = vmatpush.msrb.mxu1 %v961_v1  ;;  %v1021_v1 = vld [vmem:[%s3478_s2 + $0x328] sm:$0xff] }
 0x125   :  { %1140 = vmatpush.msrb.mxu0 %v927_v5  ;;  %1188 = vmatpush.msrb.mxu3 %v1047_v38  ;;  %v1209_v38 = vld [vmem:[%s3479_s3 + $0x8] sm:$0xff] }
 0x126   :  { %1160 = vmatpush.msrb.mxu1 %v959_v6 }
 0x127   :  { %1141 = vmatpush.msrb.mxu0 %v925_v9  ;;  %1189 = vmatpush.msrb.mxu3 %v1045_v41  ;;  %v1228_v41 = vld [vmem:[%s3479_s3 + $0xa0] sm:$0xff] }
 0x128   :  { %1161 = vmatpush.msrb.mxu1 %v957_v57 }
 0x129   :  { %1142 = vmatpush.msrb.mxu0 %v923_v62  ;;  %1190 = vmatpush.msrb.mxu3 %v1043_v44  ;;  %v1225_v44 = vld [vmem:[%s3479_s3 + $0x88] sm:$0xff] }
 0x12a   :  { %1162 = vmatpush.msrb.mxu1 %v955_v12 }
 0x12b   :  { %1143 = vmatpush.msrb.mxu0 %v921_v13  ;;  %1191 = vmatpush.msrb.mxu3 %v1041_v47 }
 0x12c   :  { %1163 = vmatpush.msrb.mxu1 %v953_v4  ;;  %1144 = vmatmul.f32.vlgmr.msrb.gmra.mxu0 %v2968_v23  ;;  %v997_v23 = vld [vmem:[%s3478_s2 + $0x268] sm:$0xff] }
 0x12d   :  { %1164 = vmatmul.f32.vlgmr.msrb.gmra.mxu1 %v3004_v37  ;;  %1177 = vmatpush.msrb.mxu2 %v997_v23  ;;  %v1236_v23 = vld [vmem:[%s3479_s3 + $0xe0] sm:$0xff] }
 0x12e   :  { %1192 = vmatpush.msrb.mxu3 %v1039_v51  ;;  %1261 = vmatpush.msra.mxu0 %v1223_v14 }
 0x12f   :  { %1178 = vmatpush.msrb.mxu2 %v995_v25  ;;  %1281 = vmatpush.msra.mxu1 %v1239_v16  ;;  %v1218_v25 = vld [vmem:[%s3479_s3 + $0x50] sm:$0xff] }
 0x130   :  { %1193 = vmatpush.msrb.mxu3 %v1037_v53  ;;  %1262 = vmatpush.msra.mxu0 %v1222_v15 }
 0x131   :  { %1179 = vmatpush.msrb.mxu2 %v993_v27  ;;  %1282 = vmatpush.msra.mxu1 %v1238_v19  ;;  %v1216_v27 = vld [vmem:[%s3479_s3 + $0x40] sm:$0xff] }
 0x132   :  { %1194 = vmatpush.msrb.mxu3 %v1035_v54  ;;  %1263 = vmatpush.msra.mxu0 %v1221_v18 }
 0x133   :  { %1180 = vmatpush.msrb.mxu2 %v991_v29  ;;  %1283 = vmatpush.msra.mxu1 %v1237_v20  ;;  %v1235_v29 = vld [vmem:[%s3479_s3 + $0xd8] sm:$0xff] }
 0x134   :  { %1195 = vmatpush.msrb.mxu3 %v1033_v56  ;;  %1264 = vmatpush.msra.mxu0 %v1220_v21 }
 0x135   :  { %1181 = vmatpush.msrb.mxu2 %v989_v30  ;;  %1284 = vmatpush.msra.mxu1 %v1236_v23  ;;  %v1234_v30 = vld [vmem:[%s3479_s3 + $0xd0] sm:$0xff] }
 0x136   :  { %1196 = vmatpush.msrb.mxu3 %v1031_v58  ;;  %1265 = vmatpush.msra.mxu0 %v1219_v24 }
 0x137   :  { %1182 = vmatpush.msrb.mxu2 %v987_v32  ;;  %1285 = vmatpush.msra.mxu1 %v1235_v29  ;;  %v1233_v32 = vld [vmem:[%s3479_s3 + $0xc8] sm:$0xff] }
 0x138   :  { %1197 = vmatpush.msrb.mxu3 %v1029_v59  ;;  %1266 = vmatpush.msra.mxu0 %v1218_v25 }
 0x139   :  { %1183 = vmatpush.msrb.mxu2 %v985_v33  ;;  %1286 = vmatpush.msra.mxu1 %v1234_v30  ;;  %v1232_v33 = vld [vmem:[%s3479_s3 + $0xc0] sm:$0xff] }
 0x13a   :  { %1198 = vmatpush.msrb.mxu3 %v1027_v60  ;;  %1267 = vmatpush.msra.mxu0 %v1217_v26 }
 0x13b   :  { %1287 = vmatpush.msra.mxu1 %v1233_v32 }
 0x13c   :  { %1199 = vmatpush.msrb.mxu3 %v1025_v61  ;;  %1268 = vmatpush.msra.mxu0 %v1216_v27 }
 0x13d   :  { %1288 = vmatpush.msra.mxu1 %v1232_v33 }
 0x13e   :  { %v689_v34 = vpop.f32.mrf.mxu0  ;;  %1200 = vmatpush.msrb.mxu3 %v1023_v0  ;;  %1269 = vmatpush.msra.mxu0 %v1215_v28 }
 0x13f   :  { %1289 = vmatpush.msra.mxu1 %v1231_v35 }
 0x140   :  { %1201 = vmatpush.msrb.mxu3 %v1021_v1  ;;  %1270 = vmatpush.msra.mxu0 %v1214_v17 }
 0x141   :  { %v709_v37 = vpop.f32.mrf.mxu1  ;;  %v729_v40 = vpop.f32.mrf.mxu2 }
 0x142   :  { %v710_v39 = vadd.f32 %v709_v37, %v689_v34  ;;  %1202 = vmatpush.msrb.mxu3 %v1019_v2  ;;  %1271 = vmatpush.msra.mxu0 %v1213_v31  ;;  %v1211_v34 = vld [vmem:[%s3479_s3 + $0x18] sm:$0xff]  ;;  %v1230_v37 = vld [vmem:[%s3479_s3 + $0xb0] sm:$0xff] }
 0x143   :  { %1290 = vmatpush.msra.mxu1 %v1230_v37 }
 0x144   :  { %v730_v42 = vadd.f32 %v729_v40, %v710_v39  ;;  %v749_v43 = vpop.f32.mrf.mxu3  ;;  %1203 = vmatpush.msrb.mxu3 %v1017_v3  ;;  %1272 = vmatpush.msra.mxu0 %v1212_v22  ;;  %v1229_v39 = vld [vmem:[%s3479_s3 + $0xa8] sm:$0xff]  ;;  %v1208_v40 = vld [vmem:[%s3479_s3] sm:$0xff] }
 0x145   :  { %1291 = vmatpush.msra.mxu1 %v1229_v39 }
 0x146   :  { %v750_v45 = vadd.f32 %v749_v43, %v730_v42  ;;  %1273 = vmatpush.msra.mxu0 %v1211_v34  ;;  %v1227_v42 = vld [vmem:[%s3479_s3 + $0x98] sm:$0xff]  ;;  %v1226_v43 = vld [vmem:[%s3479_s3 + $0x90] sm:$0xff] }
 0x147   :  { %v769_v46 = vpop.f32.mrf.mxu0  ;;  %1292 = vmatpush.msra.mxu1 %v1228_v41 }
 0x148   :  { %v770_v48 = vadd.f32 %v769_v46, %v750_v45  ;;  %1274 = vmatpush.msra.mxu0 %v1210_v36  ;;  %v1224_v45 = vld [vmem:[%s3479_s3 + $0x80] sm:$0xff] }
 0x149   :  { %1293 = vmatpush.msra.mxu1 %v1227_v42 }
 0x14a   :  { %v789_v49 = vpop.f32.mrf.mxu1  ;;  %1275 = vmatpush.msra.mxu0 %v1209_v38 }
 0x14b   :  { %v790_v50 = vadd.f32 %v789_v49, %v770_v48  ;;  %1294 = vmatpush.msra.mxu1 %v1226_v43 }
 0x14c   :  { %1276 = vmatpush.msra.mxu0 %v1208_v40 }
 0x14d   :  { %v914_v52 = vmul.f32 0.2, %v790_v50  ;;  %1295 = vmatpush.msra.mxu1 %v1225_v44 }
 0x14f   :  { %v918_v55 = vmax.f32 %v790_v50, %v914_v52  ;;  %1296 = vmatpush.msra.mxu1 %v1224_v45 }
 0x151   :  { %1104 = vmatmul.f32.vlgmr.msra.gmra.mxu2 %v918_v55 }
 0x152   :  { %1366 = vmatpush.msra.mxu2 %v1223_v14 }
 0x154   :  { %1367 = vmatpush.msra.mxu2 %v1222_v15 }
 0x156   :  { %1368 = vmatpush.msra.mxu2 %v1221_v18 }
 0x158   :  { %1369 = vmatpush.msra.mxu2 %v1220_v21 }
 0x159   :  { %1184 = vmatmul.f32.vlgmr.msrb.gmra.mxu2 %v918_v55 }
 0x15a   :  { %1370 = vmatpush.msra.mxu2 %v1219_v24 }
 0x15c   :  { %1371 = vmatpush.msra.mxu2 %v1218_v25 }
 0x15e   :  { %1372 = vmatpush.msra.mxu2 %v1217_v26 }
 0x160   :  { %1373 = vmatpush.msra.mxu2 %v1216_v27 }
 0x162   :  { %1374 = vmatpush.msra.mxu2 %v1215_v28 }
 0x164   :  { %1375 = vmatpush.msra.mxu2 %v1214_v17 }
 0x166   :  { %v809_v5 = vpop.f32.mrf.mxu2  ;;  %1376 = vmatpush.msra.mxu2 %v1213_v31 }
 0x167   :  { %v829_v6 = vpop.f32.mrf.mxu3 }
 0x168   :  { %v830_v7 = vadd.f32 %v829_v6, %v809_v5  ;;  %v849_v8 = vpop.f32.mrf.mxu0  ;;  %1377 = vmatpush.msra.mxu2 %v1212_v22 }
 0x16a   :  { %v850_v9 = vadd.f32 %v849_v8, %v830_v7  ;;  %1378 = vmatpush.msra.mxu2 %v1211_v34 }
 0x16c   :  { %v869_v57 = vpop.f32.mrf.mxu1  ;;  %1379 = vmatpush.msra.mxu2 %v1210_v36 }
 0x16d   :  { %v870_v10 = vadd.f32 %v869_v57, %v850_v9 }
 0x16e   :  { %1380 = vmatpush.msra.mxu2 %v1209_v38 }
 0x170   :  { %v889_v11 = vpop.f32.mrf.mxu2  ;;  %1381 = vmatpush.msra.mxu2 %v1208_v40 }
 0x171   :  { %v890_v62 = vadd.f32 %v889_v11, %v870_v10 }
 0x173   :  { %v909_v12 = vpop.f32.mrf.mxu3 }
 0x174   :  { %v910_v63 = vadd.f32 %v909_v12, %v890_v62  ;;  %v1242_v12 = vld [vmem:[%s3480_s4 + $0x10] sm:$0xff] }
 0x175   :  { %1320 = vmatpush.msrb.mxu0 %v1242_v12 }
 0x176   :  { %v915_v13 = vmul.f32 0.2, %v910_v63 }
 0x178   :  { %v919_v4 = vmax.f32 %v910_v63, %v915_v13  ;;  %v1243_v63 = vld [vmem:[%s3480_s4 + $0x18] sm:$0xff]  ;;  %v1240_v13 = vld [vmem:[%s3480_s4] sm:$0xff] }
 0x179   :  { %1340 = vmatpush.msrb.mxu1 %v1243_v63  ;;  %1321 = vmatpush.msrb.mxu0 %v1240_v13 }
 0x17a   :  { %1124 = vmatmul.f32.vlgmr.msra.gmra.mxu3 %v919_v4 }
 0x17b   :  { %1386 = vmatpush.msra.mxu3 %v1239_v16 }
 0x17d   :  { %1387 = vmatpush.msra.mxu3 %v1238_v19 }
 0x17f   :  { %1388 = vmatpush.msra.mxu3 %v1237_v20 }
 0x181   :  { %1389 = vmatpush.msra.mxu3 %v1236_v23 }
 0x182   :  { %1204 = vmatmul.f32.vlgmr.msrb.gmra.mxu3 %v919_v4  ;;  %v1241_v4 = vld [vmem:[%s3480_s4 + $0x8] sm:$0xff] }
 0x183   :  { %1390 = vmatpush.msra.mxu3 %v1235_v29  ;;  %1341 = vmatpush.msrb.mxu1 %v1241_v4 }
 0x185   :  { %1391 = vmatpush.msra.mxu3 %v1234_v30 }
 0x187   :  { %1392 = vmatpush.msra.mxu3 %v1233_v32 }
 0x189   :  { %1393 = vmatpush.msra.mxu3 %v1232_v33  ;;  %v1065_v46 = vpop.f32.mrf.mxu0 }
 0x18b   :  { %1394 = vmatpush.msra.mxu3 %v1231_v35 }
 0x18d   :  { %1395 = vmatpush.msra.mxu3 %v1230_v37 }
 0x18f   :  { %1396 = vmatpush.msra.mxu3 %v1229_v39 }
 0x191   :  { %1397 = vmatpush.msra.mxu3 %v1228_v41 }
 0x192   :  { %v1085_v47 = vpop.f32.mrf.mxu1 }
 0x193   :  { %1398 = vmatpush.msra.mxu3 %v1227_v42  ;;  %v1086_v49 = vadd.f32 %v1085_v47, %v1065_v46  ;;  %v1531_v46 = vld [vmem:[%s3481_s7 + $0x70] sm:$0xff] }
 0x194   :  { %v1547_v47 = vld [vmem:[%s3481_s7 + $0xf0] sm:$0xff] }
 0x195   :  { %1399 = vmatpush.msra.mxu3 %v1226_v43 }
 0x197   :  { %1400 = vmatpush.msra.mxu3 %v1225_v44  ;;  %v1532_v44 = vld [vmem:[%s3481_s7 + $0x78] sm:$0xff] }
 0x198   :  { %1549 = vmatpush.msrb.mxu2 %v1532_v44 }
 0x199   :  { %1401 = vmatpush.msra.mxu3 %v1224_v45  ;;  %v1548_v45 = vld [vmem:[%s3481_s7 + $0xf8] sm:$0xff] }
 0x19a   :  { %1550 = vmatpush.msrb.mxu2 %v1531_v46 }
 0x19b   :  { %1569 = vmatpush.msrb.mxu3 %v1548_v45 }
 0x19d   :  { %1570 = vmatpush.msrb.mxu3 %v1547_v47 }
 0x1a9   :  { %v1145_v53 = vpop.f32.mrf.mxu0 }
 0x1aa   :  { %v1165_v54 = vpop.f32.mrf.mxu1 }
 0x1ab   :  { %v1166_v59 = vadd.f32 %v1165_v54, %v1145_v53  ;;  %v1528_v53 = vld [vmem:[%s3481_s7 + $0x58] sm:$0xff] }
 0x1ac   :  { %v1544_v54 = vld [vmem:[%s3481_s7 + $0xd8] sm:$0xff] }
 0x1d4   :  { %v1105_v48 = vpop.f32.mrf.mxu2 }
 0x1d5   :  { %v1106_v50 = vadd.f32 %v1105_v48, %v1086_v49  ;;  %v1530_v49 = vld [vmem:[%s3481_s7 + $0x68] sm:$0xff] }
 0x1d6   :  { %1551 = vmatpush.msrb.mxu2 %v1530_v49 }
 0x1dc   :  { %v1185_v56 = vpop.f32.mrf.mxu2 }
 0x1dd   :  { %v1186_v61 = vadd.f32 %v1185_v56, %v1166_v59  ;;  %v1543_v56 = vld [vmem:[%s3481_s7 + $0xd0] sm:$0xff]  ;;  %v1526_v59 = vld [vmem:[%s3481_s7 + $0x48] sm:$0xff] }
 0x1fd   :  { %v1125_v51 = vpop.f32.mrf.mxu3 }
 0x1fe   :  { %v1126_v52 = vadd.f32 %v1125_v51, %v1106_v50  ;;  %v1546_v50 = vld [vmem:[%s3481_s7 + $0xe8] sm:$0xff]  ;;  %v1529_v51 = vld [vmem:[%s3481_s7 + $0x60] sm:$0xff] }
 0x1ff   :  { %1571 = vmatpush.msrb.mxu3 %v1546_v50  ;;  %1552 = vmatpush.msrb.mxu2 %v1529_v51 }
 0x200   :  { %v1247_v55 = vsel %vm1246_vm0, %v1126_v52, 0.0 }
 0x201   :  { %v1248_v58 = vrot.slane %v1247_v55, 4  ;;  %1553 = vmatpush.msrb.mxu2 %v1528_v53 }
 0x203   :  { %v1249_v60 = vadd.f32 %v1248_v58, %v1247_v55  ;;  %v1527_v55 = vld [vmem:[%s3481_s7 + $0x50] sm:$0xff] }
 0x204   :  { %1554 = vmatpush.msrb.mxu2 %v1527_v55 }
 0x205   :  { %v1250_v0 = vrot.slane %v1249_v60, 2  ;;  %v1205_v1 = vpop.f32.mrf.mxu3 }
 0x206   :  { %v1206_v2 = vadd.f32 %v1205_v1, %v1186_v61  ;;  %1555 = vmatpush.msrb.mxu2 %v1526_v59 }
 0x207   :  { %v1251_v3 = vadd.f32 %v1250_v0, %v1249_v60  ;;  %v1542_v60 = vld [vmem:[%s3481_s7 + $0xc8] sm:$0xff] }
 0x208   :  { %v1254_v5 = vsel %vm1246_vm0, %v1206_v2, 0.0 }
 0x209   :  { %v1252_v6 = vrot.slane %v1251_v3, 1  ;;  %v1255_v7 = vrot.slane %v1254_v5, 4 }
 0x20b   :  { %v1256_v8 = vadd.f32 %v1255_v7, %v1254_v5  ;;  %v1253_v9 = vadd.f32 %v1252_v6, %v1251_v3  ;;  %v1244_v3 = vld [vmem:[%s3482_s5] sm:$0x1] }
 0x20d   :  { %v1257_v57 = vrot.slane %v1256_v8, 2  ;;  %1277 = vmatmul.f32.vlgmr.msra.gmra.mxu0 %v1253_v9  ;;  %v1525_v9 = vld [vmem:[%s3481_s7 + $0x40] sm:$0xff] }
 0x20e   :  { %1436 = vmatpush.msra.mxu0 %v1242_v12  ;;  %1556 = vmatpush.msrb.mxu2 %v1525_v9 }
 0x20f   :  { %v1258_v10 = vadd.f32 %v1257_v57, %v1256_v8  ;;  %v1245_v8 = vld [vmem:[%s3483_s6] sm:$0x1] }
 0x210   :  { %1437 = vmatpush.msra.mxu0 %v1240_v13  ;;  %v1541_v57 = vld [vmem:[%s3481_s7 + $0xc0] sm:$0xff] }
 0x211   :  { %v1259_v11 = vrot.slane %v1258_v10, 1 }
 0x213   :  { %v1260_v62 = vadd.f32 %v1259_v11, %v1258_v10  ;;  %v1524_v10 = vld [vmem:[%s3481_s7 + $0x38] sm:$0xff] }
 0x214   :  { %v1540_v11 = vld [vmem:[%s3481_s7 + $0xb8] sm:$0xff]  ;;  %1557 = vmatpush.msrb.mxu2 %v1524_v10 }
 0x215   :  { %1297 = vmatmul.f32.vlgmr.msra.gmra.mxu1 %v1260_v62  ;;  %v1523_v62 = vld [vmem:[%s3481_s7 + $0x30] sm:$0xff] }
 0x216   :  { %1456 = vmatpush.msra.mxu1 %v1243_v63  ;;  %1558 = vmatpush.msrb.mxu2 %v1523_v62 }
 0x218   :  { %1457 = vmatpush.msra.mxu1 %v1241_v4 }
 0x28a   :  { %v1278_v14 = vpop.f32.mrf.mxu0 }
 0x292   :  { %v1298_v15 = vpop.f32.mrf.mxu1 }
 0x293   :  { %v1299_v16 = vadd.f32 %v1298_v15, %v1278_v14  ;;  %v1537_v14 = vld [vmem:[%s3481_s7 + $0xa0] sm:$0xff]  ;;  %v1520_v15 = vld [vmem:[%s3481_s7 + $0x18] sm:$0xff] }
 0x295   :  { %v1301_v18 = vmul.f32 0.03125, %v1299_v16  ;;  %v1536_v16 = vld [vmem:[%s3481_s7 + $0x98] sm:$0xff] }
 0x297   :  { %1600 = vmatmul.msk.f32.vlgmr.msrb.gmra.mxu0 %vm1302_vm1, %v1301_v18  ;;  %1601 = vmatmul.msk.f32.vlgmr.msrb.gmra.mxu1 %vm1302_vm1, %v1301_v18  ;;  %v1519_v18 = vld [vmem:[%s3481_s7 + $0x10] sm:$0xff] }
 0x298   :  { %1483 = vmatpush.msrb.mxu0 %v1242_v12  ;;  %1503 = vmatpush.msrb.mxu1 %v1243_v63  ;;  %v1539_v12 = vld [vmem:[%s3481_s7 + $0xb0] sm:$0xff]  ;;  %v1522_v63 = vld [vmem:[%s3481_s7 + $0x28] sm:$0xff] }
 0x299   :  { %1559 = vmatpush.msrb.mxu2 %v1522_v63 }
 0x29a   :  { %1484 = vmatpush.msrb.mxu0 %v1240_v13  ;;  %1504 = vmatpush.msrb.mxu1 %v1241_v4  ;;  %v1538_v13 = vld [vmem:[%s3481_s7 + $0xa8] sm:$0xff]  ;;  %v1521_v4 = vld [vmem:[%s3481_s7 + $0x20] sm:$0xff] }
 0x29b   :  { %1560 = vmatpush.msrb.mxu2 %v1521_v4 }
 0x29d   :  { %1561 = vmatpush.msrb.mxu2 %v1520_v15 }
 0x29f   :  { %1562 = vmatpush.msrb.mxu2 %v1519_v18 }
 0x314   :  { %v1323_v19 = vpop.f32.mrf.mxu0  ;;  %v1343_v20 = vpop.f32.mrf.mxu1 }
 0x315   :  { %v1346_v21 = vperm.slane %v1323_v19, 0  ;;  %v1347_v23 = vperm.slane %v1343_v20, 0  ;;  %v1535_v19 = vld [vmem:[%s3481_s7 + $0x90] sm:$0xff]  ;;  %v1518_v20 = vld [vmem:[%s3481_s7 + $0x8] sm:$0xff] }
 0x316   :  { %1563 = vmatpush.msrb.mxu2 %v1518_v20 }
 0x317   :  { %v3355_v24 = vsub.f32 %v1126_v52, %v1346_v21  ;;  %v3357_v25 = vsub.f32 %v1206_v2, %v1347_v23  ;;  %v1545_v52 = vld [vmem:[%s3481_s7 + $0xe0] sm:$0xff]  ;;  %v1534_v21 = vld [vmem:[%s3481_s7 + $0x88] sm:$0xff] }
 0x318   :  { %1572 = vmatpush.msrb.mxu3 %v1545_v52  ;;  %v1517_v23 = vld [vmem:[%s3481_s7] sm:$0xff] }
 0x319   :  { %v1350_v26 = vmul.f32 %v3355_v24, %v3355_v24  ;;  %v1351_v27 = vmul.f32 %v3357_v25, %v3357_v25  ;;  %1564 = vmatpush.msrb.mxu2 %v1517_v23 }
 0x31a   :  { %1573 = vmatpush.msrb.mxu3 %v1544_v54 }
 0x31b   :  { %v1352_v28 = vsel %vm1246_vm0, %v1350_v26, 0.0  ;;  %v1359_v29 = vsel %vm1246_vm0, %v1351_v27, 0.0  ;;  %v1533_v26 = vld [vmem:[%s3481_s7 + $0x80] sm:$0xff] }
 0x31c   :  { %v1353_v17 = vrot.slane %v1352_v28, 4  ;;  %v1360_v30 = vrot.slane %v1359_v29, 4  ;;  %1574 = vmatpush.msrb.mxu3 %v1543_v56 }
 0x31e   :  { %v1354_v31 = vadd.f32 %v1353_v17, %v1352_v28  ;;  %v1361_v32 = vadd.f32 %v1360_v30, %v1359_v29  ;;  %1575 = vmatpush.msrb.mxu3 %v1542_v60 }
 0x320   :  { %v1355_v22 = vrot.slane %v1354_v31, 2  ;;  %v1362_v33 = vrot.slane %v1361_v32, 2  ;;  %1576 = vmatpush.msrb.mxu3 %v1541_v57 }
 0x322   :  { %v1356_v34 = vadd.f32 %v1355_v22, %v1354_v31  ;;  %v1363_v35 = vadd.f32 %v1362_v33, %v1361_v32  ;;  %1577 = vmatpush.msrb.mxu3 %v1540_v11 }
 0x324   :  { %v1357_v36 = vrot.slane %v1356_v34, 1  ;;  %v1364_v37 = vrot.slane %v1363_v35, 1  ;;  %1578 = vmatpush.msrb.mxu3 %v1539_v12 }
 0x326   :  { %v1358_v38 = vadd.f32 %v1357_v36, %v1356_v34  ;;  %v1365_v39 = vadd.f32 %v1364_v37, %v1363_v35  ;;  %1579 = vmatpush.msrb.mxu3 %v1538_v13 }
 0x328   :  { %1382 = vmatmul.f32.vlgmr.msra.gmra.mxu2 %v1358_v38  ;;  %1402 = vmatmul.f32.vlgmr.msra.gmra.mxu3 %v1365_v39 }
 0x329   :  { %1580 = vmatpush.msrb.mxu3 %v1537_v14 }
 0x32b   :  { %1581 = vmatpush.msrb.mxu3 %v1536_v16 }
 0x32d   :  { %1582 = vmatpush.msrb.mxu3 %v1535_v19 }
 0x32f   :  { %1583 = vmatpush.msrb.mxu3 %v1534_v21 }
 0x331   :  { %1584 = vmatpush.msrb.mxu3 %v1533_v26 }
 0x3ab   :  { %v1383_v40 = vpop.f32.mrf.mxu2  ;;  %v1403_v41 = vpop.f32.mrf.mxu3 }
 0x3ac   :  { %v1404_v42 = vadd.f32 %v1403_v41, %v1383_v40 }
 0x3ae   :  { %v1406_v43 = vmul.f32 0.03125, %v1404_v42 }
 0x3b0   :  { %v1407_v48 = vadd.f32 1e-05, %v1406_v43 }
 0x3b2   :  { %1606 = vrsqrt.f32 %v1407_v48  ;;  %vm1414_vm3 = vweird.f32 %v1407_v48 }
 0x3b8   :  { %v1607_v58 = vpop.eup %1606 }
 0x3b9   :  { %v1409_v61 = vmul.f32 %v1607_v58, %v1407_v48  ;;  %vm1415_vm2 = vweird.f32 %v1607_v58 }
 0x3ba   :  { %vm1416_vm4 = vmor %vm1414_vm3, %vm1415_vm2 }
 0x3bb   :  { %v1410_v0 = vmul.f32 %v1607_v58, %v1409_v61 }
 0x3bd   :  { %v1411_v1 = vmul.f32 0.5, %v1410_v0 }
 0x3bf   :  { %v1412_v2 = vsub.f32 1.5, %v1411_v1 }
 0x3c1   :  { %v1413_v5 = vmul.f32 %v1607_v58, %v1412_v2 }
 0x3c3   :  { %v1417_v6 = vsel %vm1416_vm4, %v1607_v58, %v1413_v5 }
 0x3c4   :  { %v1418_v7 = vmul.f32 %v1417_v6, %v1244_v3 }
 0x3c6   :  { %1602 = vmatmul.msk.f32.vlgmr.msra.gmra.mxu0 %vm1302_vm1, %v1418_v7  ;;  %1603 = vmatmul.msk.f32.vlgmr.msra.gmra.mxu1 %vm1302_vm1, %v1418_v7 }
 0x3ce   :  { %1604 = vmatmul.msk.f32.vlgmr.msrb.gmra.mxu0 %vm1302_vm1, %v1245_v8  ;;  %1605 = vmatmul.msk.f32.vlgmr.msrb.gmra.mxu1 %vm1302_vm1, %v1245_v8 }
 0x443   :  { %v1439_v27 = vpop.f32.mrf.mxu0  ;;  %v1459_v28 = vpop.f32.mrf.mxu1 }
 0x444   :  { %v1462_v29 = vperm.slane %v1439_v27, 0  ;;  %v1463_v17 = vperm.slane %v1459_v28, 0 }
 0x446   :  { %v1464_v32 = vmul.f32 %v1462_v29, %v3355_v24  ;;  %v1465_v22 = vmul.f32 %v1463_v17, %v3357_v25 }
 0x44b   :  { %v1486_v30 = vpop.f32.mrf.mxu0  ;;  %v1506_v31 = vpop.f32.mrf.mxu1 }
 0x44c   :  { %v1509_v33 = vperm.slane %v1486_v30, 0  ;;  %v1510_v34 = vperm.slane %v1506_v31, 0 }
 0x44e   :  { %v1511_v35 = vadd.f32 %v1509_v33, %v1464_v32  ;;  %v1512_v36 = vadd.f32 %v1510_v34, %v1465_v22 }
 0x450   :  { %v1513_v37 = vmul.f32 0.2, %v1511_v35  ;;  %v1514_v38 = vmul.f32 0.2, %v1512_v36 }
 0x452   :  { %v1515_v39 = vmax.f32 %v1511_v35, %v1513_v37  ;;  %v1516_v40 = vmax.f32 %v1512_v36, %v1514_v38 }
 0x454   :  { %1565 = vmatmul.f32.vlgmr.msrb.gmra.mxu2 %v1515_v39  ;;  %1585 = vmatmul.f32.vlgmr.msrb.gmra.mxu3 %v1516_v40 }
 0x4d7   :  { %v1566_v41 = vpop.f32.mrf.mxu2  ;;  %v1586_v42 = vpop.f32.mrf.mxu3 }
 0x4d8   :  { %v1587_v43 = vadd.f32 %v1586_v42, %v1566_v41 }
 0x4da   :  { %v1589_v44 = vsub.f32 0.0, %v1587_v43 }
 0x4dc   :  { %v1590_v45 = vmul.f32 1.442695, %v1589_v44 }
 0x4de   :  { %1608 = vpow2.f32 %v1590_v45 }
 0x4e4   :  { %v1609_v46 = vpop.eup %1608 }
 0x4e5   :  { %v1592_v24 = vadd.f32 1.0, %v1609_v46 }
 0x4e7   :  { %1610 = vrcp.f32 %v1592_v24 }
 0x4ed   :  { %v1611_v25 = vpop.eup %1610 }
 0x4ee   :  { %1595 = vst.msk [vmem:[%s3484_s8] sm:$0x3] %vm1594_vm5, %v1611_v25 }

</bundles_post_ra>
